<compile_context>
chip_gen: v7x
topology: tpu7x:2x2x1
jax: 0.10.0
libtpu: 0.0.40
codegen_flags: <defaults>
</compile_context>

<pallas_src>
import jax
import jax.numpy as jnp
from jax.experimental import pallas as pl
from jax.experimental.pallas import tpu as pltpu


# --------------------------------------------------------------------------
# Kernel
# --------------------------------------------------------------------------
def spatial_attention_kernel(feat_ref, att_h_ref, w_img_ref, b_img_ref,
                             w_comb_ref, mask_ref, ctx_ref, alphas_ref):
    bt, num_locs = alphas_ref.shape        # static block dims: (BT, L_pad)
    hidden = att_h_ref.shape[1]            # H_pad
    feat_size = ctx_ref.shape[1]           # C_pad

    feat = feat_ref[...]                   # (BT*L, C) flattened batch tile
                                           # (bf16 by default, f32 accumulate)

    # image_att(features): one MXU matmul for the whole batch tile.
    att_img = jnp.dot(feat, w_img_ref[...],
                      preferred_element_type=jnp.float32) + b_img_ref[...]

    # relu(att_img + att_h.unsqueeze(1)): broadcast the hoisted lstm_att(h)
    # over the L locations of each batch element.  (BT*L, H) -> (BT, L, H) is
    # an aligned sublane split (L_pad % 8 == 0), i.e. layout-preserving.
    att_img = att_img.reshape(bt, num_locs, hidden)
    z = jnp.maximum(att_img + att_h_ref[...][:, None, :], 0.0)

    # combined_att -> lane-dense logits (BT, L).  b_comb is dropped (cancels
    # in the softmax); padded locations get -1e30.  NOTE: if the bundle dump
    # shows this H-reduce binding the VPU/XLU, it can be moved to the MXU via
    # a padded (H, 128) w_comb matmul (left as a bundle-gated follow-up).
    logits = jnp.sum(z * w_comb_ref[...][None, :, :], axis=-1) + mask_ref[...]

    # softmax over locations (lane axis) == PyTorch Softmax(dim=1), in f32.
    # Exact divide kept so sum(alphas)==1 holds to f32 precision (the
    # doubly-stochastic regularizer / self-check relies on it).
    m = jnp.max(logits, axis=-1, keepdims=True)
    e = jnp.exp(logits - m)
    alphas = e / jnp.sum(e, axis=-1, keepdims=True)              # (BT, L) f32
    alphas_ref[...] = alphas.astype(alphas_ref.dtype)

    # att_context = sum_l alphas[b, l] * feat[b, l, :] as a batched
    # (1, L) @ (L, C) MXU contraction.  (On v5e the M=1 batched matmuls are
    # pure latency if they ever reach the critical path; keep the MXU form on
    # v6e/v7x.)
    feat3 = feat.reshape(bt, num_locs, feat_size)                # aligned split
    ctx = jnp.einsum('bql,blc->bqc',
                     alphas[:, None, :].astype(feat.dtype), feat3,
                     preferred_element_type=jnp.float32)         # (BT, 1, C)
    ctx_ref[...] = ctx[:, 0, :].astype(ctx_ref.dtype)


# --------------------------------------------------------------------------
# Tiling / VMEM budgeting
# --------------------------------------------------------------------------
_VMEM_TILE_BUDGET = 28 << 20        # per-step working-set budget (v7x-safe)


def _ceil_to(x, m):
    return -(-x // m) * m


def _vmem_estimate(bt, l_pad, c_pad, h_pad, feat_itemsize):
    """Rough VMEM working set for one grid step (pipeline buffers included)."""
    rows = bt * l_pad
    b = c_pad * h_pad * feat_itemsize            # W_img^T (single-buffered)
    b += 2 * rows * c_pad * feat_itemsize        # feature block, 2 buffers
    b += 2 * bt * h_pad * 4                      # att_h block, 2 buffers
    b += 2 * bt * (c_pad + l_pad) * 4            # ctx + alphas outputs, 2 buffers
    b += 2 * rows * h_pad * 4                    # att_img / z f32 intermediates
    return b


def _choose_batch_tile(batch, l_pad, c_pad, h_pad, feat_itemsize,
                       vmem_budget=_VMEM_TILE_BUDGET):
    """Batch elements per grid step: target a ~1024-row feature slab per step
    (amortizes the ~0.35us/step overhead, keeps HBM streaming near roofline),
    keep >= 2 grid steps when the batch allows it (both v7x TensorCores get
    work), stay a multiple of 8 (sublane tile) whenever the grid has more than
    one step, and shrink until the working set fits the VMEM budget."""
    bt = max(8, _ceil_to(-(-1024 // max(l_pad, 1)), 8))
    if batch >= 16:
        bt = min(bt, max(8, (batch // 2) // 8 * 8))
    while bt > 8 and _vmem_estimate(bt, l_pad, c_pad, h_pad, feat_itemsize) > vmem_budget:
        bt -= 8
    if bt >= batch:
        bt = batch                 # single grid step: full-extent blocks are legal
    return bt


# --------------------------------------------------------------------------
# Per-image (decode-loop-invariant) preparation
# --------------------------------------------------------------------------
def prepare_spatial_attention(features, params, *, compute_dtype=jnp.bfloat16,
                              batch_tile=None):
    """Do all decode-loop-invariant work ONCE per image: pad L to the sublane
    tile, zero-pad C/H to the 128-lane tile, flatten (B, L, C) -> (B*L, C),
    cast the large operands (features, W_img^T) to the MXU compute dtype, and
    pick a VMEM-budgeted batch tile.  Reuse the result for every decode step."""
    f32 = jnp.float32
    B, L, C = features.shape
    H = params["w_lstm"].shape[0]

    L_pad = _ceil_to(L, 8)
    C_pad = _ceil_to(C, 128)
    H_pad = _ceil_to(H, 128)
    itemsize = jnp.dtype(compute_dtype).itemsize

    if batch_tile is None:
        batch_tile = _choose_batch_tile(B, L_pad, C_pad, H_pad, itemsize)
    else:
        batch_tile = max(1, min(int(batch_tile), B))
        if batch_tile < B and batch_tile % 8:
            batch_tile = min(B, _ceil_to(batch_tile, 8))
    B_pad = _ceil_to(B, batch_tile)

    feat = features.astype(f32)
    if (B_pad, L_pad, C_pad) != (B, L, C):
        feat = jnp.pad(feat, ((0, B_pad - B), (0, L_pad - L), (0, C_pad - C)))
    # Flatten in the wrapper (free metadata reshape) + cast once per image.
    feat_flat = feat.reshape(B_pad * L_pad, C_pad).astype(compute_dtype)

    # Pre-transposed, zero-padded, pre-cast W_img; padded rows/cols are zero so
    # padded C columns and padded H channels contribute nothing.
    w_img_t = jnp.pad(params["w_img"].T.astype(f32),
                      ((0, C_pad - C), (0, H_pad - H))).astype(compute_dtype)
    b_img = jnp.pad(params["b_img"].astype(f32), (0, H_pad - H)).reshape(1, H_pad)
    w_comb = jnp.pad(params["w_comb"].reshape(-1).astype(f32),
                     (0, H_pad - H)).reshape(1, H_pad)
    # b_comb is intentionally not passed: uniform over locations, cancels in softmax.
    loc_mask = jnp.where(jnp.arange(L_pad) < L, 0.0, -1e30).astype(f32).reshape(1, L_pad)

    est = _vmem_estimate(batch_tile, L_pad, C_pad, H_pad, itemsize)
    vmem_limit = int(min(56 << 20, max(32 << 20, int(est * 1.75))))

    return {
        "feat_flat": feat_flat, "w_img_t": w_img_t, "b_img": b_img,
        "w_comb": w_comb, "loc_mask": loc_mask,
        "shape": (B, L, C, H), "padded": (B_pad, L_pad, C_pad, H_pad),
        "batch_tile": batch_tile, "vmem_limit": vmem_limit,
    }


# --------------------------------------------------------------------------
# Per-step call
# --------------------------------------------------------------------------
def _attention_pallas_call(prep, att_h, *, const_mode):
    B_pad, L_pad, C_pad, H_pad = prep["padded"]
    bt = prep["batch_tile"]
    rows = bt * L_pad
    grid = (B_pad // bt,)

    def const_spec(shape):
        # Grid-invariant operands: index_map is constant, so a single buffer
        # suffices (saves the second W_img^T copy in VMEM).
        if const_mode is None:
            return pl.BlockSpec(shape, lambda i: (0, 0))
        return pl.BlockSpec(shape, lambda i: (0, 0), pipeline_mode=const_mode)

    return pl.pallas_call(
        spatial_attention_kernel,
        grid=grid,
        in_specs=[
            pl.BlockSpec((rows, C_pad), lambda i: (i, 0)),        # flat features
            pl.BlockSpec((bt, H_pad), lambda i: (i, 0)),          # hoisted att_h
            const_spec((C_pad, H_pad)),                           # W_img^T
            const_spec((1, H_pad)),                               # b_img
            const_spec((1, H_pad)),                               # W_comb
            const_spec((1, L_pad)),                               # location mask
        ],
        out_specs=(
            pl.BlockSpec((bt, C_pad), lambda i: (i, 0)),          # att_context
            pl.BlockSpec((bt, L_pad), lambda i: (i, 0)),          # alphas
        ),
        out_shape=(
            jax.ShapeDtypeStruct((B_pad, C_pad), jnp.float32),
            jax.ShapeDtypeStruct((B_pad, L_pad), jnp.float32),
        ),
        compiler_params=pltpu.CompilerParams(
            dimension_semantics=("parallel",),
            vmem_limit_bytes=prep["vmem_limit"]),
    )(prep["feat_flat"], att_h, prep["w_img_t"], prep["b_img"],
      prep["w_comb"], prep["loc_mask"])


def spatial_attention_prepared(prep, h, params):
    """One SpatialAttention.forward step on prepared features.
    h: (B, H) float32.  Returns (att_context (B, C), alphas (B, L))."""
    f32 = jnp.float32
    B, L, C, H = prep["shape"]
    B_pad, L_pad, C_pad, H_pad = prep["padded"]
    assert h.shape == (B, H), f"expected h of shape {(B, H)}, got {h.shape}"

    # Hoisted lstm_att(h): one XLA matmul for the whole batch (instead of B
    # degenerate M=1 MXU passes inside the kernel and one resident weight).
    att_h = (h.astype(f32) @ params["w_lstm"].T.astype(f32)
             + params["b_lstm"].astype(f32))                     # (B, H) f32
    att_h = jnp.pad(att_h, ((0, B_pad - B), (0, H_pad - H)))

    try:
        ctx, alphas = _attention_pallas_call(prep, att_h, const_mode=pl.Buffered(1))
    except Exception:
        # TODO(synk): this JAX version rejects single-buffered grid-invariant
        # operands (pl.Buffered(1)); fall back to default double buffering.
        ctx, alphas = _attention_pallas_call(prep, att_h, const_mode=None)

    return ctx[:B, :C], alphas[:B, :L]


def spatial_attention(features, h, params, *, compute_dtype=jnp.bfloat16,
                      batch_tile=None):
    """One-shot convenience wrapper.  In a real decode loop, call
    prepare_spatial_attention() once per image and spatial_attention_prepared()
    per step, so the pad/flatten/transpose/cast of the (B, L, C) features is
    not repaid at every time step."""
    prep = prepare_spatial_attention(features, params,
                                     compute_dtype=compute_dtype,
                                     batch_tile=batch_tile)
    return spatial_attention_prepared(prep, h, params)


# --------------------------------------------------------------------------
# Params / reference
# --------------------------------------------------------------------------
def init_params(key, feature_size, hidden_size):
    """Deterministic init matching nn.Linear default U(-1/sqrt(fan_in), +1/sqrt(fan_in))."""
    ks = jax.random.split(key, 6)

    def lin(kw, kb, out_f, in_f):
        bound = 1.0 / jnp.sqrt(in_f)
        w = jax.random.uniform(kw, (out_f, in_f), jnp.float32, -bound, bound)
        b = jax.random.uniform(kb, (out_f,), jnp.float32, -bound, bound)
        return w, b

    w_img, b_img = lin(ks[0], ks[1], hidden_size, feature_size)
    w_lstm, b_lstm = lin(ks[2], ks[3], hidden_size, hidden_size)
    w_comb, b_comb = lin(ks[4], ks[5], 1, hidden_size)
    return {"w_img": w_img, "b_img": b_img,
            "w_lstm": w_lstm, "b_lstm": b_lstm,
            "w_comb": w_comb, "b_comb": b_comb}


def reference_forward(features, h, p):
    """Pure-JAX reference of the PyTorch SpatialAttention.forward."""
    att_img = features @ p["w_img"].T + p["b_img"]                   # (B, L, H)
    att_h = h @ p["w_lstm"].T + p["b_lstm"]                          # (B, H)
    z = jnp.maximum(att_img + att_h[:, None, :], 0.0)                # (B, L, H)
    logits = (z @ p["w_comb"].T + p["b_comb"])[..., 0]               # (B, L)
    alphas = jax.nn.softmax(logits, axis=1)                          # (B, L)
    ctx = jnp.sum(features * alphas[:, :, None], axis=1)             # (B, C)
    return ctx, alphas


if __name__ == "__main__":
    # Small demo shapes (production: L=49/196, C=512/2048, H=512).  C and H
    # are zero-padded to the 128-lane tile inside prepare_spatial_attention;
    # batch_tile=8 gives a 2-step grid of 128-row feature slabs.
    B, L, C, H = 16, 16, 32, 32

    key = jax.random.PRNGKey(0)
    kf, kh, kp = jax.random.split(key, 3)
    features = jax.random.normal(kf, (B, L, C), jnp.float32)
    h = jax.random.normal(kh, (B, H), jnp.float32)
    params = init_params(kp, C, H)

    ctx_gold, alphas_gold = reference_forward(features, h, params)

    # Exact path (f32 features on the MXU): tight check against the reference.
    ctx32, alphas32 = spatial_attention(features, h, params,
                                        compute_dtype=jnp.float32)
    jax.block_until_ready((ctx32, alphas32))
    assert ctx32.shape == (B, C) and alphas32.shape == (B, L)
    assert jnp.allclose(ctx32, ctx_gold, atol=1e-4, rtol=1e-4)
    assert jnp.allclose(alphas32, alphas_gold, atol=1e-4, rtol=1e-4)
    assert jnp.allclose(jnp.sum(alphas32, axis=1), 1.0, atol=1e-5)

    # Default fast path: bf16 features / W_img on the MXU, f32 accumulate and
    # f32 softmax; prepared once and reused (as in a decode loop).  Tolerance
    # loosened for the bf16 cast of the feature stream.
    prep = prepare_spatial_attention(features, params)
    ctx, alphas = spatial_attention_prepared(prep, h, params)
    jax.block_until_ready((ctx, alphas))
    assert ctx.shape == (B, C) and alphas.shape == (B, L)
    assert jnp.allclose(ctx, ctx_gold, atol=3e-2, rtol=3e-2)
    assert jnp.allclose(alphas, alphas_gold, atol=3e-2, rtol=3e-2)
    assert jnp.allclose(jnp.sum(alphas, axis=1), 1.0, atol=1e-5)

    print("KERNEL_OK")
</pallas_src>

<mosaic_0001>
module attributes {stable_mosaic.version = 11 : i64} {
  func.func @spatial_attention_kernel(%arg0: i32, %arg1: memref<128x128xf32, #tpu.memory_space<vmem>>, %arg2: memref<8x128xf32, #tpu.memory_space<vmem>>, %arg3: memref<128x128xf32, #tpu.memory_space<vmem>>, %arg4: memref<1x128xf32, #tpu.memory_space<vmem>>, %arg5: memref<1x128xf32, #tpu.memory_space<vmem>>, %arg6: memref<1x16xf32, #tpu.memory_space<vmem>>, %arg7: memref<8x128xf32, #tpu.memory_space<vmem>>, %arg8: memref<8x16xf32, #tpu.memory_space<vmem>>) attributes {dimension_semantics = [#tpu.dimension_semantics<parallel>], iteration_bounds = array<i64: 2>, scalar_prefetch = 0 : i64, scratch_operands = 0 : i64, tpu.core_type = #tpu.core_type<tc>, window_params = [{transform_indices = @transform_0, window_bounds = array<i64: 128, 128>}, {transform_indices = @transform_1, window_bounds = array<i64: 8, 128>}, {pipeline_mode = #tpu.pipeline_mode<synchronous>, transform_indices = @transform_2, window_bounds = array<i64: 128, 128>}, {pipeline_mode = #tpu.pipeline_mode<synchronous>, transform_indices = @transform_3, window_bounds = array<i64: 1, 128>}, {pipeline_mode = #tpu.pipeline_mode<synchronous>, transform_indices = @transform_4, window_bounds = array<i64: 1, 128>}, {pipeline_mode = #tpu.pipeline_mode<synchronous>, transform_indices = @transform_5, window_bounds = array<i64: 1, 16>}, {transform_indices = @transform_6, window_bounds = array<i64: 8, 128>}, {transform_indices = @transform_7, window_bounds = array<i64: 8, 16>}]} {
    %c0 = arith.constant 0 : index
    %c0_0 = arith.constant 0 : index
    %0 = vector.load %arg1[%c0, %c0_0] : memref<128x128xf32, #tpu.memory_space<vmem>>, vector<128x128xf32>
    %c0_1 = arith.constant 0 : index
    %c0_2 = arith.constant 0 : index
    %1 = vector.load %arg3[%c0_1, %c0_2] : memref<128x128xf32, #tpu.memory_space<vmem>>, vector<128x128xf32>
    %cst = arith.constant dense<0.000000e+00> : vector<128x128xf32>
    %2 = tpu.matmul %0, %1, %cst {dimension_numbers = #tpu.dot_dimension_numbers<[1], [0], [0], [1], [0, 0, 1, 1], [], []>} : vector<128x128xf32>, vector<128x128xf32>, vector<128x128xf32> -> vector<128x128xf32>
    %c0_3 = arith.constant 0 : index
    %c0_4 = arith.constant 0 : index
    %3 = vector.load %arg4[%c0_3, %c0_4] : memref<1x128xf32, #tpu.memory_space<vmem>>, vector<1x128xf32>
    %4 = vector.broadcast %3 : vector<1x128xf32> to vector<128x128xf32>
    %5 = arith.addf %2, %4 : vector<128x128xf32>
    %6 = vector.shape_cast %5 : vector<128x128xf32> to vector<8x16x128xf32>
    %c0_5 = arith.constant 0 : index
    %c0_6 = arith.constant 0 : index
    %7 = vector.load %arg2[%c0_5, %c0_6] : memref<8x128xf32, #tpu.memory_space<vmem>>, vector<8x128xf32>
    %8 = vector.shape_cast %7 : vector<8x128xf32> to vector<8x1x128xf32>
    %9 = vector.broadcast %8 : vector<8x1x128xf32> to vector<8x16x128xf32>
    %10 = arith.addf %6, %9 : vector<8x16x128xf32>
    %cst_7 = arith.constant 0.000000e+00 : f32
    %11 = vector.broadcast %cst_7 : f32 to vector<8x16x128xf32>
    %12 = arith.maximumf %10, %11 : vector<8x16x128xf32>
    %c0_8 = arith.constant 0 : index
    %c0_9 = arith.constant 0 : index
    %13 = vector.load %arg5[%c0_8, %c0_9] : memref<1x128xf32, #tpu.memory_space<vmem>>, vector<1x128xf32>
    %14 = vector.shape_cast %13 : vector<1x128xf32> to vector<1x1x128xf32>
    %15 = vector.broadcast %14 : vector<1x1x128xf32> to vector<8x16x128xf32>
    %16 = arith.mulf %12, %15 : vector<8x16x128xf32>
    %cst_10 = arith.constant dense<0.000000e+00> : vector<8x16xf32>
    %17 = vector.multi_reduction <add>, %16, %cst_10 [2] : vector<8x16x128xf32> to vector<8x16xf32>
    %c0_11 = arith.constant 0 : index
    %c0_12 = arith.constant 0 : index
    %18 = vector.load %arg6[%c0_11, %c0_12] : memref<1x16xf32, #tpu.memory_space<vmem>>, vector<1x16xf32>
    %19 = vector.broadcast %18 : vector<1x16xf32> to vector<8x16xf32>
    %20 = arith.addf %17, %19 : vector<8x16xf32>
    %cst_13 = arith.constant dense<0xFF800000> : vector<8xf32>
    %21 = vector.multi_reduction <maximumf>, %20, %cst_13 [1] : vector<8x16xf32> to vector<8xf32>
    %22 = vector.shape_cast %21 : vector<8xf32> to vector<8x1xf32>
    %23 = vector.broadcast %22 : vector<8x1xf32> to vector<8x16xf32>
    %24 = arith.subf %20, %23 : vector<8x16xf32>
    %25 = math.exp %24 : vector<8x16xf32>
    %cst_14 = arith.constant dense<0.000000e+00> : vector<8xf32>
    %26 = vector.multi_reduction <add>, %25, %cst_14 [1] : vector<8x16xf32> to vector<8xf32>
    %27 = vector.shape_cast %26 : vector<8xf32> to vector<8x1xf32>
    %28 = vector.broadcast %27 : vector<8x1xf32> to vector<8x16xf32>
    %29 = arith.divf %25, %28 : vector<8x16xf32>
    %c0_15 = arith.constant 0 : index
    %c0_16 = arith.constant 0 : index
    %30 = vector.load %arg8[%c0_15, %c0_16] : memref<8x16xf32, #tpu.memory_space<vmem>>, vector<8x16xf32>
    tpu.vector_store %arg8[%c0_15, %c0_16], %29 {strides = array<i32>} : memref<8x16xf32, #tpu.memory_space<vmem>>, vector<8x16xf32>,
    %31 = vector.shape_cast %0 : vector<128x128xf32> to vector<8x16x128xf32>
    %32 = vector.shape_cast %29 : vector<8x16xf32> to vector<8x1x16xf32>
    "tpu.trace_start"() <{level = 10 : i32, message = "bql,blc->bqc"}> : () -> ()
    %cst_17 = arith.constant dense<0.000000e+00> : vector<8x1x128xf32>
    %33 = tpu.matmul %32, %31, %cst_17 {dimension_numbers = #tpu.dot_dimension_numbers<[2], [1], [1], [2], [0, 0, 0, 1, 1, 2], [0], [0]>} : vector<8x1x16xf32>, vector<8x16x128xf32>, vector<8x1x128xf32> -> vector<8x1x128xf32>
    "tpu.trace_stop"() : () -> ()
    %34 = vector.shape_cast %33 : vector<8x1x128xf32> to vector<8x128xf32>
    %c0_18 = arith.constant 0 : index
    %c0_19 = arith.constant 0 : index
    %35 = vector.load %arg7[%c0_18, %c0_19] : memref<8x128xf32, #tpu.memory_space<vmem>>, vector<8x128xf32>
    tpu.vector_store %arg7[%c0_18, %c0_19], %34 {strides = array<i32>} : memref<8x128xf32, #tpu.memory_space<vmem>>, vector<8x128xf32>,
    return
  }
  func.func @transform_0(%arg0: i32) -> (i32, i32) {
    %c0_i32 = arith.constant 0 : i32
    %c0_i32_0 = arith.constant 0 : i32
    return %arg0, %c0_i32 : i32, i32
  }
  func.func @transform_1(%arg0: i32) -> (i32, i32) {
    %c0_i32 = arith.constant 0 : i32
    %c0_i32_0 = arith.constant 0 : i32
    return %arg0, %c0_i32 : i32, i32
  }
  func.func @transform_2(%arg0: i32) -> (i32, i32) {
    %c0_i32 = arith.constant 0 : i32
    %c0_i32_0 = arith.constant 0 : i32
    %c0_i32_1 = arith.constant 0 : i32
    return %c0_i32, %c0_i32_0 : i32, i32
  }
  func.func @transform_3(%arg0: i32) -> (i32, i32) {
    %c0_i32 = arith.constant 0 : i32
    %c0_i32_0 = arith.constant 0 : i32
    %c0_i32_1 = arith.constant 0 : i32
    return %c0_i32, %c0_i32_0 : i32, i32
  }
  func.func @transform_4(%arg0: i32) -> (i32, i32) {
    %c0_i32 = arith.constant 0 : i32
    %c0_i32_0 = arith.constant 0 : i32
    %c0_i32_1 = arith.constant 0 : i32
    return %c0_i32, %c0_i32_0 : i32, i32
  }
  func.func @transform_5(%arg0: i32) -> (i32, i32) {
    %c0_i32 = arith.constant 0 : i32
    %c0_i32_0 = arith.constant 0 : i32
    %c0_i32_1 = arith.constant 0 : i32
    return %c0_i32, %c0_i32_0 : i32, i32
  }
  func.func @transform_6(%arg0: i32) -> (i32, i32) {
    %c0_i32 = arith.constant 0 : i32
    %c0_i32_0 = arith.constant 0 : i32
    return %arg0, %c0_i32 : i32, i32
  }
  func.func @transform_7(%arg0: i32) -> (i32, i32) {
    %c0_i32 = arith.constant 0 : i32
    %c0_i32_0 = arith.constant 0 : i32
    return %arg0, %c0_i32 : i32, i32
  }
}

module attributes {stable_mosaic.version = 11 : i64} {
  func.func @spatial_attention_kernel(%arg0: i32, %arg1: memref<128x128xf32, #tpu.memory_space<vmem>>, %arg2: memref<8x128xf32, #tpu.memory_space<vmem>>, %arg3: memref<128x128xf32, #tpu.memory_space<vmem>>, %arg4: memref<1x128xf32, #tpu.memory_space<vmem>>, %arg5: memref<1x128xf32, #tpu.memory_space<vmem>>, %arg6: memref<1x16xf32, #tpu.memory_space<vmem>>, %arg7: memref<8x128xf32, #tpu.memory_space<vmem>>, %arg8: memref<8x16xf32, #tpu.memory_space<vmem>>) attributes {dimension_semantics = [#tpu.dimension_semantics<parallel>], iteration_bounds = array<i64: 2>, scalar_prefetch = 0 : i64, scratch_operands = 0 : i64, tpu.core_type = #tpu.core_type<tc>, window_params = [{transform_indices = @transform_0, window_bounds = array<i64: 128, 128>}, {transform_indices = @transform_1, window_bounds = array<i64: 8, 128>}, {pipeline_mode = #tpu.pipeline_mode<synchronous>, transform_indices = @transform_2, window_bounds = array<i64: 128, 128>}, {pipeline_mode = #tpu.pipeline_mode<synchronous>, transform_indices = @transform_3, window_bounds = array<i64: 1, 128>}, {pipeline_mode = #tpu.pipeline_mode<synchronous>, transform_indices = @transform_4, window_bounds = array<i64: 1, 128>}, {pipeline_mode = #tpu.pipeline_mode<synchronous>, transform_indices = @transform_5, window_bounds = array<i64: 1, 16>}, {transform_indices = @transform_6, window_bounds = array<i64: 8, 128>}, {transform_indices = @transform_7, window_bounds = array<i64: 8, 16>}]} {
    %c0 = arith.constant 0 : index
    %c0_0 = arith.constant 0 : index
    %0 = vector.load %arg1[%c0, %c0_0] : memref<128x128xf32, #tpu.memory_space<vmem>>, vector<128x128xf32>
    %c0_1 = arith.constant 0 : index
    %c0_2 = arith.constant 0 : index
    %1 = vector.load %arg3[%c0_1, %c0_2] : memref<128x128xf32, #tpu.memory_space<vmem>>, vector<128x128xf32>
    %cst = arith.constant dense<0.000000e+00> : vector<128x128xf32>
    %2 = tpu.matmul %0, %1, %cst {dimension_numbers = #tpu.dot_dimension_numbers<[1], [0], [0], [1], [0, 0, 1, 1], [], []>} : vector<128x128xf32>, vector<128x128xf32>, vector<128x128xf32> -> vector<128x128xf32>
    %c0_3 = arith.constant 0 : index
    %c0_4 = arith.constant 0 : index
    %3 = vector.load %arg4[%c0_3, %c0_4] : memref<1x128xf32, #tpu.memory_space<vmem>>, vector<1x128xf32>
    %4 = vector.broadcast %3 : vector<1x128xf32> to vector<128x128xf32>
    %5 = arith.addf %2, %4 : vector<128x128xf32>
    %6 = vector.shape_cast %5 : vector<128x128xf32> to vector<8x16x128xf32>
    %c0_5 = arith.constant 0 : index
    %c0_6 = arith.constant 0 : index
    %7 = vector.load %arg2[%c0_5, %c0_6] : memref<8x128xf32, #tpu.memory_space<vmem>>, vector<8x128xf32>
    %8 = vector.shape_cast %7 : vector<8x128xf32> to vector<8x1x128xf32>
    %9 = vector.broadcast %8 : vector<8x1x128xf32> to vector<8x16x128xf32>
    %10 = arith.addf %6, %9 : vector<8x16x128xf32>
    %cst_7 = arith.constant 0.000000e+00 : f32
    %11 = vector.broadcast %cst_7 : f32 to vector<8x16x128xf32>
    %12 = arith.maximumf %10, %11 : vector<8x16x128xf32>
    %c0_8 = arith.constant 0 : index
    %c0_9 = arith.constant 0 : index
    %13 = vector.load %arg5[%c0_8, %c0_9] : memref<1x128xf32, #tpu.memory_space<vmem>>, vector<1x128xf32>
    %14 = vector.shape_cast %13 : vector<1x128xf32> to vector<1x1x128xf32>
    %15 = vector.broadcast %14 : vector<1x1x128xf32> to vector<8x16x128xf32>
    %16 = arith.mulf %12, %15 : vector<8x16x128xf32>
    %cst_10 = arith.constant dense<0.000000e+00> : vector<8x16xf32>
    %17 = vector.multi_reduction <add>, %16, %cst_10 [2] : vector<8x16x128xf32> to vector<8x16xf32>
    %c0_11 = arith.constant 0 : index
    %c0_12 = arith.constant 0 : index
    %18 = vector.load %arg6[%c0_11, %c0_12] : memref<1x16xf32, #tpu.memory_space<vmem>>, vector<1x16xf32>
    %19 = vector.broadcast %18 : vector<1x16xf32> to vector<8x16xf32>
    %20 = arith.addf %17, %19 : vector<8x16xf32>
    %cst_13 = arith.constant dense<0xFF800000> : vector<8xf32>
    %21 = vector.multi_reduction <maximumf>, %20, %cst_13 [1] : vector<8x16xf32> to vector<8xf32>
    %22 = vector.shape_cast %21 : vector<8xf32> to vector<8x1xf32>
    %23 = vector.broadcast %22 : vector<8x1xf32> to vector<8x16xf32>
    %24 = arith.subf %20, %23 : vector<8x16xf32>
    %25 = math.exp %24 : vector<8x16xf32>
    %cst_14 = arith.constant dense<0.000000e+00> : vector<8xf32>
    %26 = vector.multi_reduction <add>, %25, %cst_14 [1] : vector<8x16xf32> to vector<8xf32>
    %27 = vector.shape_cast %26 : vector<8xf32> to vector<8x1xf32>
    %28 = vector.broadcast %27 : vector<8x1xf32> to vector<8x16xf32>
    %29 = arith.divf %25, %28 : vector<8x16xf32>
    %c0_15 = arith.constant 0 : index
    %c0_16 = arith.constant 0 : index
    %30 = vector.load %arg8[%c0_15, %c0_16] : memref<8x16xf32, #tpu.memory_space<vmem>>, vector<8x16xf32>
    tpu.vector_store %arg8[%c0_15, %c0_16], %29 {strides = array<i32>} : memref<8x16xf32, #tpu.memory_space<vmem>>, vector<8x16xf32>,
    %31 = vector.shape_cast %0 : vector<128x128xf32> to vector<8x16x128xf32>
    %32 = vector.shape_cast %29 : vector<8x16xf32> to vector<8x1x16xf32>
    "tpu.trace_start"() <{level = 10 : i32, message = "bql,blc->bqc"}> : () -> ()
    %cst_17 = arith.constant dense<0.000000e+00> : vector<8x1x128xf32>
    %33 = tpu.matmul %32, %31, %cst_17 {dimension_numbers = #tpu.dot_dimension_numbers<[2], [1], [1], [2], [0, 0, 0, 1, 1, 2], [0], [0]>} : vector<8x1x16xf32>, vector<8x16x128xf32>, vector<8x1x128xf32> -> vector<8x1x128xf32>
    "tpu.trace_stop"() : () -> ()
    %34 = vector.shape_cast %33 : vector<8x1x128xf32> to vector<8x128xf32>
    %c0_18 = arith.constant 0 : index
    %c0_19 = arith.constant 0 : index
    %35 = vector.load %arg7[%c0_18, %c0_19] : memref<8x128xf32, #tpu.memory_space<vmem>>, vector<8x128xf32>
    tpu.vector_store %arg7[%c0_18, %c0_19], %34 {strides = array<i32>} : memref<8x128xf32, #tpu.memory_space<vmem>>, vector<8x128xf32>,
    return
  }
  func.func @transform_0(%arg0: i32) -> (i32, i32) {
    %c0_i32 = arith.constant 0 : i32
    %c0_i32_0 = arith.constant 0 : i32
    return %arg0, %c0_i32 : i32, i32
  }
  func.func @transform_1(%arg0: i32) -> (i32, i32) {
    %c0_i32 = arith.constant 0 : i32
    %c0_i32_0 = arith.constant 0 : i32
    return %arg0, %c0_i32 : i32, i32
  }
  func.func @transform_2(%arg0: i32) -> (i32, i32) {
    %c0_i32 = arith.constant 0 : i32
    %c0_i32_0 = arith.constant 0 : i32
    %c0_i32_1 = arith.constant 0 : i32
    return %c0_i32, %c0_i32_0 : i32, i32
  }
  func.func @transform_3(%arg0: i32) -> (i32, i32) {
    %c0_i32 = arith.constant 0 : i32
    %c0_i32_0 = arith.constant 0 : i32
    %c0_i32_1 = arith.constant 0 : i32
    return %c0_i32, %c0_i32_0 : i32, i32
  }
  func.func @transform_4(%arg0: i32) -> (i32, i32) {
    %c0_i32 = arith.constant 0 : i32
    %c0_i32_0 = arith.constant 0 : i32
    %c0_i32_1 = arith.constant 0 : i32
    return %c0_i32, %c0_i32_0 : i32, i32
  }
  func.func @transform_5(%arg0: i32) -> (i32, i32) {
    %c0_i32 = arith.constant 0 : i32
    %c0_i32_0 = arith.constant 0 : i32
    %c0_i32_1 = arith.constant 0 : i32
    return %c0_i32, %c0_i32_0 : i32, i32
  }
  func.func @transform_6(%arg0: i32) -> (i32, i32) {
    %c0_i32 = arith.constant 0 : i32
    %c0_i32_0 = arith.constant 0 : i32
    return %arg0, %c0_i32 : i32, i32
  }
  func.func @transform_7(%arg0: i32) -> (i32, i32) {
    %c0_i32 = arith.constant 0 : i32
    %c0_i32_0 = arith.constant 0 : i32
    return %arg0, %c0_i32 : i32, i32
  }
}

</mosaic_0001>

<bundles_post_ra>
// kernel: tpu_custom_call.1
= control target key start
LH: loop header
LB: loop body
LE: loop exit
PB: predicated region body
PF: predicated region fallthrough
CT: control target
= control target key end

     0   :  { %s3515_s0 = inlined_call_operand.hbm [shape: f32[256,128], index: 0, kind: input, shape index: {}]   ;;  %s3516_s1 = inlined_call_operand.hbm [shape: f32[16,128], index: 1, kind: input, shape index: {}]   ;;  %s3517_s2 = inlined_call_operand.hbm [shape: f32[128,128], index: 2, kind: input, shape index: {}]   ;;  %s3518_s3 = inlined_call_operand.vmem [shape: f32[1,128], index: 3, kind: input, shape index: {}]   ;;  %s3519_s4 = inlined_call_operand.vmem [shape: f32[1,128], index: 4, kind: input, shape index: {}]   ;;  %s3520_s5 = inlined_call_operand.vmem [shape: f32[1,16], index: 5, kind: input, shape index: {}]   ;;  %s3521_s6 = inlined_call_operand.hbm [shape: f32[16,128], index: 6, kind: output, shape index: {0}]   ;;  %s3522_s7 = inlined_call_operand.hbm [shape: f32[16,16], index: 7, kind: output, shape index: {1}]  }
   0x1   :  { %3535 = sst [smem:[#allocation19_spill]] %s3515_s0 }
   0x2   :  { %3536 = sst [smem:[#allocation20_spill]] %s3517_s2 }
   0x3   :  { %13 = vsyncpa [#allocation3], 0 }
   0x4   :  { %15 = vsyncpa [#allocation3 + $0x1], 0 }
   0x5   :  { %16 = vsyncpa [#allocation6], 0 }
   0x6   :  { %18 = vsyncpa [#allocation6 + $0x1], 0 }
   0x7   :  { %19 = vsyncpa [#allocation4], 0 }
   0x8   :  { %21 = vsyncpa [#allocation4 + $0x1], 0 }
   0x9   :  { %22 = vsyncpa [#allocation10], 0 }
   0xa   :  { %24 = vsyncpa [#allocation10 + $0x1], 0  ;;  %s2754_s24 = smov 0   ;;  %s2756_s25 = smov 0  }
   0xb   :  { %s2758_s26 = smov 0   ;;  %s2760_s27 = smov 0  }
   0xc LB: > { %3537 = sst [smem:[#allocation16_spill]] %s2696_s26  ;;  %s2775_s28 = sadd.s32 4294967295, %s2700_s27   ;;  %s2700_s27 = sphi %s2760_s27, %s3569_s27   ;;  %s2696_s26 = sphi %s2758_s26, %s3571_s26   ;;  %s2692_s25 = sphi %s2756_s25, %s3573_s25   ;;  %s2688_s24 = sphi %s2754_s24, %s3572_s24  }
   0xd   : > { %s2124_s29 = sadd.s32 4294967294, %s2700_s27   ;;  %p50_p0 = scmp.ne.s32.totalorder %s2692_s25, %s2688_s24 }
   0xe   : > { %p3523_p1 = scmp.eq.s32.totalorder %s2775_s28, 0  ;;  %p190_p3 = scmp.eq.s32.totalorder %s2124_s29, 1 }
   0xf   : > { %p2125_p5 = scmp.ge.s32.totalorder %s2700_s27, 1  ;;  %p223_p7 = scmp.lt.s32.totalorder %s2700_s27, 3 }
  0x10   : > { %p2784_p4 = por %p3523_p1, %p50_p0  ;;  %p2789_p6 = por %p190_p3, %p50_p0 }
  0x11   : > { %p2794_p8 = pnand %p2125_p5, %p223_p7  ;;  %s2702_s10 = smov [#allocation7]  }
  0x12   : > { %s3538_s30 = scalar_select %p2784_p4, 1, 0 }
  0x13   : > { %s3539_s8 = scalar_select %p2789_p6, 1, 0 }
  0x14   : > { %s3540_s9 = scalar_select %p2794_p8, 1, 0 }
  0x15   : > { %s235_s11 = sshll.u32 %s2702_s10, 4  ;;  %p2393_p9 = pneg %p2794_p8  ;;  %s2798_s11 = int_to_ptr.vmem [resolvable:$true] %s235_s11 }
  0x16   : > { %s2810_s13 = sadd.s32 1, %s2700_s27   ;;  %s37_s14 = sadd.s32 1, %s2696_s26 }
  0x17   : > { %p2805_p11 = pnand %p2393_p9, %p3523_p1  ;;  %3542 = sst [smem:[#allocation17_spill]] %s2810_s13 }
  0x18   : > { %s34_s15 = ssub.s32 %s2700_s27, %s2810_s13  ;;  %s3543_s2 = sld [smem:[#allocation20_spill]] }
  0x19   : > { %p2508_p13 = pneg %p2805_p11 }
  0x1e   : > { %s2506_s18 = scalar_lea.hbm %s3543_s2, 2048 }
  0x1f   : > { %p2507_p12 = scmp.ne.s32.totalorder %s3543_s2, %s2506_s18  ;;  %p2513_p5 = scmp.lt.u32.totalorder %s2506_s18, %s3543_s2 }
  0x21   : > { %p2509_p0 = pnand %p2508_p13, %p2507_p12 }
  0x23   : > { %p2510_p3 = pneg %p2509_p0 }
  0x25   : > { %p2515_p7 = pnand %p2513_p5, %p2510_p3 }
  0x27   : > { %2518 = shalt.err (!%p2515_p7)
}
  0x28   : > { %s2519_s23 = scalar_lea.vmem %s2798_s11, 2048  ;;  %p2527_p2 = scmp.lt.s32.totalorder %s2798_s11, %s2798_s11 }
  0x29   : > { %p2520_p9 = scmp.ne.s32.totalorder %s2798_s11, %s2519_s23  ;;  %p2528_p6 = scmp.lt.s32.totalorder %s2519_s23, %s2519_s23 }
  0x2b   : > { %p2522_p10 = pnand %p2520_p9, %p2508_p13  ;;  %p2529_p4 = por %p2528_p6, %p2527_p2 }
  0x2d   : > { %p2523_p1 = pneg %p2522_p10 }
  0x2f   : > { %p2530_p8 = pnand %p2529_p4, %p2523_p1 }
  0x31   : > { %2533 = shalt.err (!%p2530_p8)
}
  0x32   : > { %s3526_s29 = smov 128   ;;  %s3527_s10 = smov 8  }
  0x33   : > { %2396 = dma.hbm_to_vmem [thread:$0]  (!%p2805_p11), %s3543_s2, 2048, %s2798_s11, [#allocation6], %s3526_s29, %s3526_s29, %s3527_s10  }
  0x34   : > { %p35_p1 = scmp.eq.s32.totalorder %s34_s15, 0  ;;  %p44_p2 = scmp.ne.s32.totalorder %s2696_s26, %s2692_s25 }
  0x35   : > { %p45_p4 = scmp.eq.s32.totalorder %s2700_s27, 0  ;;  %p2412_p6 = scmp.lt.s32.totalorder %s2700_s27, 2 }
  0x36   : > { %s2844_s18 = scalar_select %p35_p1, %s2696_s26, %s37_s14  }
  0x37   : > { %p46_p8 = por %p45_p4, %p44_p2  ;;  %p3545_p10 = scmp.eq.s32.totalorder %s2775_s28, 1 }
  0x38   : > { %3544 = sst [smem:[#allocation18_spill]] %s2844_s18  ;;  %s2853_s12 = sand.u32 1, %s2696_s26  }
  0x39   : > { %p2848_p12 = por %p3545_p10, %p44_p2  ;;  %s2156_s20 = sshll.u32 %s2700_s27, 11 }
  0x3a   : > { %s2128_s21 = sshll.u32 %s2853_s12, 7  ;;  %s3547_s0 = sld [smem:[#allocation19_spill]] }
  0x3b   : > { %s3546_s19 = scalar_select %p2848_p12, 1, 0 }
  0x3c   : > { %s262_s14 = scalar_lea.vmem [#allocation2], %s2128_s21  ;;  %p2862_p11 = pnand %p2412_p6, %p46_p8 }
  0x3d   : > { %s269_s23 = sshll.u32 %s262_s14, 4  ;;  %s259_s29 = scalar_lea.sflag [#allocation3], %s2853_s12  ;;  %s2866_s23 = int_to_ptr.vmem [resolvable:$true] %s269_s23 }
  0x3e   : > { %p2536_p0 = pneg %p2862_p11 }
  0x40   : > { %s2860_s15 = scalar_lea.hbm %s3547_s0, %s2156_s20  ;;  %s2539_s11 = scalar_lea.hbm %s3547_s0, 4096 }
  0x41   : > { %s2534_s10 = scalar_lea.hbm %s2860_s15, 2048  ;;  %p2540_p7 = scmp.lt.u32.totalorder %s2860_s15, %s3547_s0 }
  0x42   : > { %p2535_p13 = scmp.ne.s32.totalorder %s2860_s15, %s2534_s10  ;;  %p2541_p9 = scmp.lt.u32.totalorder %s2539_s11, %s2534_s10 }
  0x43   : > { %p2543_p2 = scmp.lt.u32.totalorder %s2534_s10, %s2860_s15 }
  0x44   : > { %p2537_p3 = pnand %p2536_p0, %p2535_p13  ;;  %p2542_p1 = por %p2541_p9, %p2540_p7 }
  0x46   : > { %p2538_p5 = pneg %p2537_p3  ;;  %p2544_p4 = por %p2543_p2, %p2542_p1 }
  0x48   : > { %p2545_p6 = pnand %p2544_p4, %p2538_p5 }
  0x4a   : > { %2548 = shalt.err (!%p2545_p6)
}
  0x4b   : > { %s2549_s17 = scalar_lea.vmem %s2866_s23, 2048  ;;  %s2705_s20 = smov [#allocation2]  }
  0x4c   : > { %p2550_p8 = scmp.ne.s32.totalorder %s2866_s23, %s2549_s17  ;;  %s2554_s21 = sshll.u32 %s2705_s20, 4  ;;  %s2555_s21 = int_to_ptr.vmem [resolvable:$false] %s2554_s21 }
  0x4d   : > { %s2556_s22 = scalar_lea.vmem %s2555_s21, 4096  ;;  %p2557_p3 = scmp.lt.s32.totalorder %s2866_s23, %s2555_s21 }
  0x4e   : > { %p2552_p10 = pnand %p2550_p8, %p2536_p0  ;;  %p2558_p7 = scmp.lt.s32.totalorder %s2556_s22, %s2549_s17 }
  0x50   : > { %p2553_p13 = pneg %p2552_p10  ;;  %p2559_p9 = por %p2558_p7, %p2557_p3 }
  0x52   : > { %p2560_p1 = pnand %p2559_p9, %p2553_p13 }
  0x54   : > { %2563 = shalt.err (!%p2560_p1)
}
  0x55   : > { %s3549_s10 = smov 8   ;;  %s3550_s11 = smov 128  }
  0x56   : > { %2400 = dma.hbm_to_vmem [thread:$0]  (!%p2862_p11), %s2860_s15, 2048, %s2866_s23, %s259_s29, %s3550_s11, %s3550_s11, %s3549_s10  }
  0x57   : > { %s2131_s14 = sshll.u32 %s2853_s12, 3  ;;  %s2132_s20 = sshll.u32 %s2700_s27, 7 }
  0x58   : > { %s2905_s22 = scalar_lea.hbm %s3516_s1, %s2132_s20  ;;  %s283_s0 = scalar_lea.vmem [#allocation5], %s2131_s14 }
  0x59   : > { %s290_s2 = sshll.u32 %s283_s0, 4  ;;  %s3551_s18 = sand.u32 1, %s2700_s27   ;;  %s291_s2 = int_to_ptr.vmem [resolvable:$true] %s290_s2 }
  0x5a   : > { %s280_s26 = scalar_lea.sflag [#allocation6], %s3551_s18  ;;  %s2564_s13 = scalar_lea.hbm %s2905_s22, 128 }
  0x5b   : > { %p2565_p5 = scmp.ne.s32.totalorder %s2905_s22, %s2564_s13  ;;  %s2569_s15 = scalar_lea.hbm %s3516_s1, 256 }
  0x5c   : > { %p2570_p6 = scmp.lt.u32.totalorder %s2905_s22, %s3516_s1  ;;  %p2571_p8 = scmp.lt.u32.totalorder %s2569_s15, %s2564_s13 }
  0x5d   : > { %p2567_p2 = pnand %p2565_p5, %p2536_p0  ;;  %p2573_p13 = scmp.lt.u32.totalorder %s2564_s13, %s2905_s22 }
  0x5e   : > { %p2572_p10 = por %p2571_p8, %p2570_p6 }
  0x5f   : > { %p2568_p4 = pneg %p2567_p2 }
  0x60   : > { %p2574_p3 = por %p2573_p13, %p2572_p10 }
  0x62   : > { %p2575_p7 = pnand %p2574_p3, %p2568_p4 }
  0x64   : > { %2578 = shalt.err (!%p2575_p7)
}
  0x65   : > { %s2579_s0 = scalar_lea.vmem %s291_s2, 128  ;;  %s2706_s18 = smov [#allocation5]  }
  0x66   : > { %p2580_p9 = scmp.ne.s32.totalorder %s291_s2, %s2579_s0  ;;  %s2584_s11 = sshll.u32 %s2706_s18, 4  ;;  %s2585_s11 = int_to_ptr.vmem [resolvable:$false] %s2584_s11 }
  0x67   : > { %s2586_s14 = scalar_lea.vmem %s2585_s11, 256  ;;  %p2587_p2 = scmp.lt.s32.totalorder %s291_s2, %s2585_s11 }
  0x68   : > { %p2582_p1 = pnand %p2580_p9, %p2536_p0  ;;  %p2588_p12 = scmp.lt.s32.totalorder %s2586_s14, %s2579_s0 }
  0x6a   : > { %p2583_p5 = pneg %p2582_p1  ;;  %p2589_p6 = por %p2588_p12, %p2587_p2 }
  0x6c   : > { %p2590_p8 = pnand %p2589_p6, %p2583_p5 }
  0x6e   : > { %2593 = shalt.err (!%p2590_p8)
}
  0x6f   : > { %2403 = dma.hbm_to_vmem [thread:$0]  (!%p2862_p11), %s2905_s22, 128, %s291_s2, %s280_s26  }
  0x70   : > { %p3552_p4 = scmp.ne.s32.totalorder %s3540_s9, 0 }
  0x71   : > { %s2931_s13 = sand.u32 (!%p3552_p4), 1, %s2692_s25   ;;  %p3553_p12 = scmp.ne.s32.totalorder (!%p3552_p4), %s3538_s30, 0 }
  0x72   : > { %299 = sbr.rel (%p3552_p4) target bundleno = 1642 (0x66a), region = 44  ;;  %s2134_s20 = sshll.u32 (!%p3552_p4), %s2931_s13, 7 }
  0x73   : > { %s302_s17 = scalar_lea.sflag (!%p3552_p4), [#allocation3], %s2931_s13  ;;  %s2935_s21 = scalar_lea.vmem (!%p3552_p4), [#allocation2], %s2134_s20 }
  0x79   : > { %2667 = dma.done.wait (%p3553_p12), %s302_s17, 2048  }
  0x7a   : > { %2669 = vsyncadd (%p3553_p12), %s302_s17, 4294965248  ;;  %s310_s2 = sand.u32 1, %s2775_s28   ;;  %s2943_s26 = sshll.u32 %s2931_s13, 3 }
  0x7b   : > { %s311_s9 = scalar_lea.sflag [#allocation6], %s310_s2  ;;  %s314_s16 = scalar_lea.vmem [#allocation5], %s2943_s26 }
  0x7c   : > { %2671 = dma.done.wait (%p3553_p12), %s311_s9, 128  }
  0x7d   : > { %2673 = vsyncadd (%p3553_p12), %s311_s9, 4294967168  ;;  %p3554_p11 = scmp.eq.s32.totalorder %s2775_s28, 0 }
  0x7f   : > { %2675 = dma.done.wait (%p3554_p11), [#allocation6], 2048   ;;  %p3555_p0 = pmov %p3554_p11 }
  0x80   : > { %v376_v0 = vld [vmem:[#allocation7] sm:$0xff]  ;;  %v377_v1 = vld [vmem:[#allocation7 + $0x8] sm:$0xff]  ;;  %v378_v2 = vld [vmem:[#allocation7 + $0x10] sm:$0xff]  ;;  %v2707_v47 = vmov 1966171168   ;;  %v550_v49 = vlaneseq  ;;  %vm828_vm0 = vcmask 130112  }
  0x81   : > { %2677 = vsyncadd (%p3555_p0), [#allocation6], 4294965248  ;;  %v2325_v3 = vpack.c.bf16 %v377_v1, %v376_v0  ;;  %v379_v4 = vld [vmem:[#allocation7 + $0x18] sm:$0xff]  ;;  %v380_v6 = vld [vmem:[#allocation7 + $0x20] sm:$0xff]  ;;  %v548_v48 = vunpack.c.l.s4 %v2707_v47  ;;  %vm893_vm1 = vcmask 1041409   ;;  %vm895_vm2 = vcmask 1042434  }
  0x82   : > { %v2329_v5 = vpack.c.bf16 %v379_v4, %v378_v2  ;;  %v381_v7 = vld [vmem:[#allocation7 + $0x28] sm:$0xff]  ;;  %v382_v9 = vld [vmem:[#allocation7 + $0x30] sm:$0xff]  ;;  %v383_v10 = vld [vmem:[#allocation7 + $0x38] sm:$0xff]  ;;  %v3033_v51 = vshrl.u32 %v550_v49, 7  ;;  %vm897_vm3 = vcmask 1043459   ;;  %vm899_vm4 = vcmask 1044484  }
  0x83   : > { %2326 = vmatprep.subr.bf16.mxu0 %v2325_v3  ;;  %v2333_v8 = vpack.c.bf16 %v381_v7, %v380_v6  ;;  %v2955_v11 = vld [vmem:[%s2935_s21] sm:$0xff]  ;;  %v2959_v12 = vld [vmem:[%s2935_s21 + $0x10] sm:$0xff]  ;;  %v2962_v13 = vld [vmem:[%s2935_s21 + $0x18] sm:$0xff]  ;;  %v2337_v25 = vpack.c.bf16 %v383_v10, %v382_v9  ;;  %v549_v50 = vunpack.c.0.s8 %v548_v48  ;;  %vm901_vm5 = vcmask 1045509   ;;  %s358_s10 = scalar_lea.vmem [#allocation9], %s2943_s26  ;;  %s2152_s0 = sshll.u32 %s2775_s28, 7 }
  0x84   : > { %2328 = vmatpush3.bf16.msra.mxu0 %v2325_v3  ;;  %2245 = vmatprep.mubr.f32.mxu0 %v2955_v11  ;;  %v2965_v14 = vld [vmem:[%s2935_s21 + $0x20] sm:$0xff]  ;;  %v2970_v16 = vld [vmem:[%s2935_s21 + $0x28] sm:$0xff]  ;;  %v2973_v17 = vld [vmem:[%s2935_s21 + $0x30] sm:$0xff]  ;;  %v3039_v56 = vsub.s32 0, %v3033_v51  ;;  %vm903_vm6 = vcmask 1046534   ;;  %vm905_vm7 = vcmask 1047559   ;;  %s3438_s14 = scalar_lea.hbm %s3522_s7, %s2152_s0 }
  0x85   : > { %2330 = vmatprep.subr.bf16.mxu0 %v2329_v5  ;;  %v2976_v18 = vld [vmem:[%s2935_s21 + $0x38] sm:$0xff]  ;;  %v384_v19 = vld [vmem:[#allocation7 + $0x40] sm:$0xff]  ;;  %v2983_v22 = vld [vmem:[%s2935_s21 + $0x40] sm:$0xff]  ;;  %v552_v52 = vsub.s32 %v549_v50, %v3033_v51  ;;  %vm908_vm8 = vcmask 130048   ;;  %vm2710_vm9 = vmmov 0   ;;  %s1990_s20 = sshll.u32 %s358_s10, 4  ;;  %s1991_s20 = int_to_ptr.vmem [resolvable:$true] %s1990_s20 }
  0x86   : > { %v2986_v23 = vld [vmem:[%s2935_s21 + $0x48] sm:$0xff]  ;;  %v2989_v24 = vld [vmem:[%s2935_s21 + $0x50] sm:$0xff]  ;;  %v2994_v27 = vld [vmem:[%s2935_s21 + $0x58] sm:$0xff]  ;;  %s1964_s17 = scalar_lea.sflag [#allocation10], %s2931_s13  ;;  %p3566_p13 = scmp.ne.s32.totalorder %s3546_s19, 0 }
  0x87   : > { %v2997_v28 = vld [vmem:[%s2935_s21 + $0x60] sm:$0xff]  ;;  %v3000_v29 = vld [vmem:[%s2935_s21 + $0x68] sm:$0xff]  ;;  %v385_v30 = vld [vmem:[#allocation7 + $0x48] sm:$0xff]  ;;  %s2712_s2 = smov [#allocation9]  }
  0x88   : > { %2332 = vmatpush3.bf16.msra.mxu0 %v2329_v5  ;;  %v3007_v33 = vld [vmem:[%s2935_s21 + $0x70] sm:$0xff]  ;;  %v3010_v34 = vld [vmem:[%s2935_s21 + $0x78] sm:$0xff]  ;;  %v2341_v36 = vpack.c.bf16 %v385_v30, %v384_v19  ;;  %v386_v37 = vld [vmem:[#allocation7 + $0x50] sm:$0xff]  ;;  %s2598_s9 = sshll.u32 %s2712_s2, 4  ;;  %s2599_s9 = int_to_ptr.vmem [resolvable:$false] %s2598_s9 }
  0x89   : > { %2334 = vmatprep.subr.bf16.mxu0 %v2333_v8  ;;  %v387_v38 = vld [vmem:[#allocation7 + $0x58] sm:$0xff]  ;;  %v388_v40 = vld [vmem:[#allocation7 + $0x60] sm:$0xff]  ;;  %v389_v41 = vld [vmem:[#allocation7 + $0x68] sm:$0xff]  ;;  %p2601_p9 = scmp.lt.s32.totalorder %s1991_s20, %s2599_s9 }
  0x8a   : > { %v2345_v39 = vpack.c.bf16 %v387_v38, %v386_v37  ;;  %v2349_v42 = vpack.c.bf16 %v389_v41, %v388_v40  ;;  %v390_v43 = vld [vmem:[#allocation7 + $0x70] sm:$0xff]  ;;  %v391_v44 = vld [vmem:[#allocation7 + $0x78] sm:$0xff] }
  0x8b   : > { %v2353_v45 = vpack.c.bf16 %v391_v44, %v390_v43  ;;  %v3015_v46 = vld [vmem:[%s2935_s21 + $0x8] sm:$0xff]  ;;  %v3044_v58 = vld [vmem:[%s3518_s3] ss:$0 sm:$0xff]  ;;  %s2594_s21 = scalar_lea.vmem %s1991_s20, 128 }
  0x8c   : > { %2336 = vmatpush3.bf16.msra.mxu0 %v2333_v8  ;;  %v544_v53 = vld [vmem:[%s314_s16] sm:$0xff]  ;;  %p2595_p10 = scmp.ne.s32.totalorder %s1991_s20, %s2594_s21  ;;  %s2600_s16 = scalar_lea.vmem %s2599_s9, 256 }
  0x8d   : > { %2338 = vmatprep.subr.bf16.mxu0 %v2337_v25  ;;  %v553_v54 = vrot.slane %v544_v53, %v552_v52  ;;  %v3053_v6 = vld [vmem:[%s3519_s4] ss:$0 sm:$0xff]  ;;  %v546_v7 = vcombine.high %v544_v53, %v544_v53  ;;  %p2602_p1 = scmp.lt.s32.totalorder %s2600_s16, %s2594_s21 }
  0x8e   : > { %p2596_p3 = pnand %p2595_p10, %p3566_p13 }
  0x8f   : > { %v569_v55 = vrot.slane %v553_v54, %v552_v52  ;;  %v561_v57 = vcombine.high %v553_v54, %v553_v54  ;;  %v560_v41 = vrot.slane %v546_v7, %v552_v52  ;;  %p2603_p5 = por %p2602_p1, %p2601_p9 }
  0x90   : > { %2340 = vmatpush3.bf16.msra.mxu0 %v2337_v25  ;;  %p2597_p7 = pneg %p2596_p3 }
  0x91   : > { %2342 = vmatprep.subr.bf16.mxu0 %v2341_v36  ;;  %v598_v59 = vrot.slane %v569_v55, %v3039_v56  ;;  %v583_v60 = vrot.slane %v561_v57, %v552_v52  ;;  %v591_v5 = vcombine.high %v569_v55, %v569_v55 }
  0x92   : > { %p2604_p2 = pnand %p2603_p5, %p2597_p7 }
  0x93   : > { %v602_v1 = vrot.slane %v583_v60, %v3039_v56  ;;  %v593_v40 = vcombine.high %v583_v60, %v583_v60  ;;  %v562_v60 = vcombine.high %v560_v41, %v560_v41 }
  0x94   : > { %2344 = vmatpush3.bf16.msra.mxu0 %v2341_v36 }
  0x95   : > { %2346 = vmatprep.subr.bf16.mxu0 %v2345_v39  ;;  %v610_v57 = vrot.slane %v593_v40, %v3039_v56 }
  0x98   : > { %2348 = vmatpush3.bf16.msra.mxu0 %v2345_v39  ;;  %v606_v39 = vrot.slane %v591_v5, %v3039_v56 }
  0x99   : > { %2350 = vmatprep.subr.bf16.mxu0 %v2349_v42 }
  0x9c   : > { %2352 = vmatpush3.bf16.msra.mxu0 %v2349_v42 }
  0x9d   : > { %2354 = vmatprep.subr.bf16.mxu0 %v2353_v45 }
  0xa0   : > { %2356 = vmatpush3.bf16.msra.mxu0 %v2353_v45 }
  0xa3   : > { %2246 = vmatmul.mubr.f32.vlgmr.msra.gmra.mrb[0].mxu0 %v3015_v46 }
  0xa4   : > { %2248 = vmatprep.mubr.f32.mxu0 %v2959_v12 }
  0xa7   : > { %2249 = vmatmul.mubr.f32.gmra.mrb[2].mxu0 %v2962_v13 }
  0xa8   : > { %2251 = vmatprep.mubr.f32.mxu0 %v2965_v14 }
  0xab   : > { %2252 = vmatmul.mubr.f32.gmra.mrb[4].mxu0 %v2970_v16 }
  0xac   : > { %2254 = vmatprep.mubr.f32.mxu0 %v2973_v17 }
  0xaf   : > { %2255 = vmatmul.mubr.f32.gmra.mrb[6].mxu0 %v2976_v18 }
  0xb0   : > { %2257 = vmatprep.mubr.f32.mxu0 %v2983_v22 }
  0xb3   : > { %2258 = vmatmul.mubr.f32.gmra.mrb[8].mxu0 %v2986_v23 }
  0xb4   : > { %2260 = vmatprep.mubr.f32.mxu0 %v2989_v24 }
  0xb7   : > { %2261 = vmatmul.mubr.f32.gmra.mrb[10].mxu0 %v2994_v27 }
  0xb8   : > { %2263 = vmatprep.mubr.f32.mxu0 %v2997_v28 }
  0xbb   : > { %2264 = vmatmul.mubr.f32.gmra.mrb[12].mxu0 %v3000_v29 }
  0xbc   : > { %2266 = vmatprep.mubr.f32.mxu0 %v3007_v33 }
  0xbf   : > { %2267 = vmatmul.mubr.f32.gmra.mrb[14].mxu0 %v3010_v34 }
 0x176   : > { %v2247_v61 = vpop.f32.mrb[0].mxu0 }
 0x177   : > { %v471_v62 = vadd.f32 %v2247_v61, %v3044_v58  ;;  %v465_v63 = vpop.f32.mrb[1].mxu0 }
 0x178   : > { %v466_v0 = vadd.f32 %v3044_v58, %v465_v63 }
 0x179   : > { %v636_v2 = vadd.f32 %v598_v59, %v471_v62 }
 0x17a   : > { %v635_v3 = vadd.f32 %v598_v59, %v466_v0  ;;  %v2250_v4 = vpop.f32.mrb[2].mxu0  ;;  %v576_v59 = vrot.slane %v560_v41, %v552_v52 }
 0x17b   : > { %v481_v8 = vadd.f32 %v2250_v4, %v3044_v58  ;;  %v475_v9 = vpop.f32.mrb[3].mxu0  ;;  %v652_v10 = vmax.f32 %v636_v2, 0.0 }
 0x17c   : > { %v476_v19 = vadd.f32 %v3044_v58, %v475_v9  ;;  %v651_v25 = vmax.f32 %v635_v3, 0.0  ;;  %v614_v7 = vrot.slane %v576_v59, %v3039_v56  ;;  %v590_v9 = vrot.slane %v562_v60, %v552_v52 }
 0x17d   : > { %v675_v30 = vmul.f32 %v3053_v6, %v652_v10  ;;  %v638_v36 = vadd.f32 %v602_v1, %v481_v8 }
 0x17e   : > { %v637_v37 = vadd.f32 %v602_v1, %v476_v19  ;;  %v2253_v38 = vpop.f32.mrb[4].mxu0  ;;  %v674_v53 = vmul.f32 %v3053_v6, %v651_v25  ;;  %v618_v41 = vrot.slane %v590_v9, %v3039_v56 }
 0x17f   : > { %v491_v42 = vadd.f32 %v2253_v38, %v3044_v58  ;;  %692 = vadd.xlane.f32.xlu0 %v675_v30  ;;  %v485_v43 = vpop.f32.mrb[5].mxu0  ;;  %v654_v44 = vmax.f32 %v638_v36, 0.0 }
 0x180   : > { %v486_v45 = vadd.f32 %v3044_v58, %v485_v43  ;;  %v653_v47 = vmax.f32 %v637_v37, 0.0  ;;  %v592_v43 = vcombine.high %v576_v59, %v576_v59 }
 0x181   : > { %v640_v48 = vadd.f32 %v606_v39, %v491_v42  ;;  %v677_v50 = vmul.f32 %v3053_v6, %v654_v44 }
 0x182   : > { %v639_v54 = vadd.f32 %v606_v39, %v486_v45  ;;  %v2256_v55 = vpop.f32.mrb[6].mxu0  ;;  %v676_v3 = vmul.f32 %v3053_v6, %v653_v47 }
 0x183   : > { %v656_v61 = vmax.f32 %v640_v48, 0.0  ;;  %v501_v62 = vadd.f32 %v2256_v55, %v3044_v58  ;;  %696 = vadd.xlane.f32.xlu1 %v677_v50  ;;  %v495_v63 = vpop.f32.mrb[7].mxu0  ;;  %690 = vadd.xlane.f32.xlu0 %v674_v53 }
 0x184   : > { %v655_v0 = vmax.f32 %v639_v54, 0.0  ;;  %v496_v1 = vadd.f32 %v3044_v58, %v495_v63 }
 0x185   : > { %v642_v2 = vadd.f32 %v610_v57, %v501_v62  ;;  %v679_v30 = vmul.f32 %v3053_v6, %v656_v61  ;;  %v594_v61 = vcombine.high %v590_v9, %v590_v9 }
 0x186   : > { %v641_v4 = vadd.f32 %v610_v57, %v496_v1  ;;  %v2259_v5 = vpop.f32.mrb[8].mxu0  ;;  %v678_v8 = vmul.f32 %v3053_v6, %v655_v0  ;;  %v622_v57 = vrot.slane %v592_v43, %v3039_v56 }
 0x187   : > { %v658_v10 = vmax.f32 %v642_v2, 0.0  ;;  %v511_v19 = vadd.f32 %v2259_v5, %v3044_v58  ;;  %v505_v25 = vpop.f32.mrb[9].mxu0  ;;  %694 = vadd.xlane.f32.xlu1 %v676_v3 }
 0x188   : > { %v657_v36 = vmax.f32 %v641_v4, 0.0  ;;  %v506_v37 = vadd.f32 %v3044_v58, %v505_v25  ;;  %698 = vadd.xlane.f32.xlu0 %v678_v8 }
 0x189   : > { %v644_v38 = vadd.f32 %v614_v7, %v511_v19  ;;  %v681_v47 = vmul.f32 %v3053_v6, %v658_v10 }
 0x18a   : > { %v643_v39 = vadd.f32 %v614_v7, %v506_v37  ;;  %v2262_v40 = vpop.f32.mrb[10].mxu0  ;;  %v680_v42 = vmul.f32 %v3053_v6, %v657_v36  ;;  %v626_v7 = vrot.slane %v594_v61, %v3039_v56 }
 0x18b   : > { %v660_v52 = vmax.f32 %v644_v38, 0.0  ;;  %v521_v44 = vadd.f32 %v2262_v40, %v3044_v58  ;;  %v515_v45 = vpop.f32.mrb[11].mxu0  ;;  %700 = vadd.xlane.f32.xlu1 %v679_v30 }
 0x18c   : > { %v659_v48 = vmax.f32 %v643_v39, 0.0  ;;  %v516_v50 = vadd.f32 %v3044_v58, %v515_v45  ;;  %702 = vadd.xlane.f32.xlu0 %v680_v42 }
 0x18d   : > { %v646_v53 = vadd.f32 %v618_v41, %v521_v44  ;;  %v683_v0 = vmul.f32 %v3053_v6, %v660_v52  ;;  %v2708_v44 = vmov 0  }
 0x18e   : > { %v645_v54 = vadd.f32 %v618_v41, %v516_v50  ;;  %v2265_v55 = vpop.f32.mrb[12].mxu0  ;;  %v682_v60 = vmul.f32 %v3053_v6, %v659_v48  ;;  %2456 = vset.pattern.permute.xlu0 %v2708_v44  ;;  %2455 = vset.pattern.permute.xlu1 %v2708_v44 }
 0x18f   : > { %v662_v59 = vmax.f32 %v646_v53, 0.0  ;;  %v531_v62 = vadd.f32 %v2265_v55, %v3044_v58  ;;  %v525_v63 = vpop.f32.mrb[13].mxu0  ;;  %704 = vadd.xlane.f32.xlu1 %v681_v47 }
 0x190   : > { %v661_v1 = vmax.f32 %v645_v54, 0.0  ;;  %v526_v2 = vadd.f32 %v3044_v58, %v525_v63  ;;  %706 = vadd.xlane.f32.xlu0 %v682_v60 }
 0x191   : > { %v648_v3 = vadd.f32 %v622_v57, %v531_v62  ;;  %v685_v25 = vmul.f32 %v3053_v6, %v662_v59 }
 0x192   : > { %v647_v4 = vadd.f32 %v622_v57, %v526_v2  ;;  %v2268_v5 = vpop.f32.mrb[14].mxu0  ;;  %v684_v8 = vmul.f32 %v3053_v6, %v661_v1 }
 0x193   : > { %v664_v10 = vmax.f32 %v648_v3, 0.0  ;;  %v541_v9 = vadd.f32 %v2268_v5, %v3044_v58  ;;  %v535_v19 = vpop.f32.mrb[15].mxu0  ;;  %708 = vadd.xlane.f32.xlu1 %v683_v0 }
 0x194   : > { %v663_v30 = vmax.f32 %v647_v4, 0.0  ;;  %v536_v36 = vadd.f32 %v3044_v58, %v535_v19  ;;  %710 = vadd.xlane.f32.xlu0 %v684_v8  ;;  %v2141_v58 = vld [vmem:[%s3520_s5] ss:$0 sm:$0xff] }
 0x195   : > { %v650_v37 = vadd.f32 %v626_v7, %v541_v9  ;;  %v687_v41 = vmul.f32 %v3053_v6, %v664_v10 }
 0x196   : > { %v649_v38 = vadd.f32 %v626_v7, %v536_v36  ;;  %v686_v39 = vmul.f32 %v3053_v6, %v663_v30 }
 0x197   : > { %v666_v40 = vmax.f32 %v650_v37, 0.0  ;;  %712 = vadd.xlane.f32.xlu1 %v685_v25 }
 0x198   : > { %v665_v42 = vmax.f32 %v649_v38, 0.0  ;;  %714 = vadd.xlane.f32.xlu0 %v686_v39 }
 0x199   : > { %v689_v52 = vmul.f32 %v3053_v6, %v666_v40 }
 0x19a   : > { %v688_v43 = vmul.f32 %v3053_v6, %v665_v42 }
 0x19b   : > { %716 = vadd.xlane.f32.xlu1 %v687_v41 }
 0x19c   : > { %718 = vadd.xlane.f32.xlu0 %v688_v43 }
 0x19f   : > { %720 = vadd.xlane.f32.xlu1 %v689_v52 }
 0x1b0   : > { %733 = vbcast.lane.b32.xlu1 %v2141_v58, 264 }
 0x1b2   : > { %729 = vbcast.lane.b32.xlu0 %v2141_v58, 256 }
 0x20c   : > { %v693_v45 = vpop.xlane.xlu0 %692 }
 0x210   : > { %v697_v47 = vpop.xlane.xlu1 %696  ;;  %v691_v48 = vpop.xlane.xlu0 %690 }
 0x214   : > { %v695_v50 = vpop.xlane.xlu1 %694 }
 0x215   : > { %v699_v53 = vpop.xlane.xlu0 %698 }
 0x218   : > { %v701_v54 = vpop.xlane.xlu1 %700 }
 0x219   : > { %v703_v55 = vpop.xlane.xlu0 %702 }
 0x21c   : > { %v705_v57 = vpop.xlane.xlu1 %704 }
 0x21d   : > { %v707_v6 = vpop.xlane.xlu0 %706 }
 0x220   : > { %v709_v60 = vpop.xlane.xlu1 %708 }
 0x221   : > { %v711_v61 = vpop.xlane.xlu0 %710 }
 0x224   : > { %v713_v59 = vpop.xlane.xlu1 %712 }
 0x225   : > { %v715_v62 = vpop.xlane.xlu0 %714 }
 0x228   : > { %v717_v63 = vpop.xlane.xlu1 %716 }
 0x229   : > { %v719_v0 = vpop.xlane.xlu0 %718 }
 0x22c   : > { %v721_v1 = vpop.xlane.xlu1 %720 }
 0x22d   : > { %v730_v2 = vpop.permute.xlu0 %729 }
 0x22e   : > { %v3094_v3 = vadd.f32 %v730_v2, %v695_v50  ;;  %v3103_v8 = vadd.f32 %v730_v2, %v691_v48  ;;  %v3115_v25 = vadd.f32 %v730_v2, %v699_v53  ;;  %v3121_v36 = vadd.f32 %v730_v2, %v703_v55 }
 0x22f   : > { %v3127_v38 = vadd.f32 %v730_v2, %v707_v6  ;;  %v3133_v40 = vadd.f32 %v730_v2, %v711_v61  ;;  %v3136_v41 = vadd.f32 %v730_v2, %v715_v62  ;;  %v3139_v42 = vadd.f32 %v730_v2, %v719_v0 }
 0x230   : > { %v734_v4 = vpop.permute.xlu1 %733  ;;  %776 = vperm.xlu0 %2456, %v3094_v3   ;;  %v818_v53 = vand.u32 127, %v550_v49 }
 0x231   : > { %v3097_v5 = vadd.f32 %v734_v4, %v693_v45  ;;  %v3099_v7 = vadd.f32 %v734_v4, %v701_v54  ;;  %v3105_v10 = vadd.f32 %v734_v4, %v705_v57  ;;  %v3109_v9 = vadd.f32 %v734_v4, %v697_v47 }
 0x232   : > { %v3111_v19 = vadd.f32 %v734_v4, %v709_v60  ;;  %v3117_v30 = vadd.f32 %v734_v4, %v713_v59  ;;  %v3123_v37 = vadd.f32 %v734_v4, %v717_v63  ;;  %v3129_v39 = vadd.f32 %v734_v4, %v721_v1 }
 0x233   : > { %773 = vperm.xlu1 %2455, %v3097_v5   ;;  %v823_v55 = vadd.s32 4294967288, %v818_v53  ;;  %v3144_v60 = vsub.s32 %v818_v53, %v3033_v51 }
 0x234   : > { %785 = vperm.xlu0 %2456, %v3099_v7  }
 0x235   : > { %v3147_v61 = vsub.s32 %v823_v55, %v3033_v51 }
 0x237   : > { %770 = vperm.xlu1 %2455, %v3103_v8  }
 0x238   : > { %791 = vperm.xlu0 %2456, %v3105_v10  }
 0x23b   : > { %779 = vperm.xlu1 %2455, %v3109_v9  }
 0x23c   : > { %797 = vperm.xlu0 %2456, %v3111_v19  }
 0x23f   : > { %782 = vperm.xlu1 %2455, %v3115_v25  }
 0x240   : > { %803 = vperm.xlu0 %2456, %v3117_v30  }
 0x243   : > { %788 = vperm.xlu1 %2455, %v3121_v36  }
 0x244   : > { %809 = vperm.xlu0 %2456, %v3123_v37  }
 0x247   : > { %794 = vperm.xlu1 %2455, %v3127_v38  }
 0x248   : > { %815 = vperm.xlu0 %2456, %v3129_v39  }
 0x24b   : > { %800 = vperm.xlu1 %2455, %v3133_v40  }
 0x24f   : > { %806 = vperm.xlu1 %2455, %v3136_v41  }
 0x253   : > { %812 = vperm.xlu1 %2455, %v3139_v42  }
 0x2af   : > { %v777_v43 = vpop.permute.xlu0 %776 }
 0x2b0   : > { %v833_v1 = vrot.slane %v777_v43, %v3144_v60 }
 0x2b2   : > { %v774_v52 = vpop.permute.xlu1 %773 }
 0x2b3   : > { %v786_v44 = vpop.permute.xlu0 %785  ;;  %v827_v55 = vrot.slane %v774_v52, %v3147_v61 }
 0x2b4   : > { %v846_v4 = vrot.slane %v786_v44, %v3147_v61 }
 0x2b6   : > { %v771_v58 = vpop.permute.xlu1 %770 }
 0x2b7   : > { %v792_v45 = vpop.permute.xlu0 %791  ;;  %v822_v49 = vrot.slane %v771_v58, %v3144_v60 }
 0x2b9   : > { %v829_v44 = vsel %vm828_vm0, %v827_v55, %v822_v49 }
 0x2ba   : > { %v780_v47 = vpop.permute.xlu1 %779 }
 0x2bb   : > { %v798_v48 = vpop.permute.xlu0 %797  ;;  %v837_v59 = vrot.slane %v780_v47, %v3147_v61  ;;  %v855_v47 = vrot.slane %v792_v45, %v3147_v61 }
 0x2bc   : > { %v864_v43 = vrot.slane %v798_v48, %v3147_v61 }
 0x2be   : > { %v783_v50 = vpop.permute.xlu1 %782 }
 0x2bf   : > { %v804_v57 = vpop.permute.xlu0 %803  ;;  %v842_v62 = vrot.slane %v783_v50, %v3144_v60  ;;  %v838_v50 = vsel %vm828_vm0, %v837_v59, %v833_v1 }
 0x2c0   : > { %v873_v32 = vrot.slane %v804_v57, %v3147_v61  ;;  %v894_v45 = vsel %vm893_vm1, %v838_v50, %v829_v44  ;;  %v931_v44 = vsub.s32 4, %v3033_v51 }
 0x2c1   : > { %v847_v58 = vsel %vm828_vm0, %v846_v4, %v842_v62 }
 0x2c2   : > { %v789_v54 = vpop.permute.xlu1 %788  ;;  %v896_v62 = vsel %vm895_vm2, %v847_v58, %v894_v45  ;;  %v919_v58 = vsub.s32 1, %v3033_v51 }
 0x2c3   : > { %v810_v63 = vpop.permute.xlu0 %809  ;;  %v851_v2 = vrot.slane %v789_v54, %v3144_v60 }
 0x2c4   : > { %v882_v59 = vrot.slane %v810_v63, %v3147_v61 }
 0x2c6   : > { %v795_v6 = vpop.permute.xlu1 %794 }
 0x2c7   : > { %v860_v53 = vrot.slane %v795_v6, %v3144_v60  ;;  %v856_v6 = vsel %vm828_vm0, %v855_v47, %v851_v2 }
 0x2c8   : > { %v898_v49 = vsel %vm897_vm3, %v856_v6, %v896_v62  ;;  %v923_v62 = vsub.s32 2, %v3033_v51 }
 0x2c9   : > { %v865_v48 = vsel %vm828_vm0, %v864_v43, %v860_v53 }
 0x2ca   : > { %v801_v0 = vpop.permute.xlu1 %800  ;;  %v900_v4 = vsel %vm899_vm4, %v865_v48, %v898_v49 }
 0x2cb   : > { %v869_v35 = vrot.slane %v801_v0, %v3144_v60  ;;  %v816_v0 = vpop.permute.xlu0 %815 }
 0x2cc   : > { %v891_v55 = vrot.slane %v816_v0, %v3147_v61  ;;  %v943_v0 = vsub.s32 7, %v3033_v51 }
 0x2cd   : > { %v874_v1 = vsel %vm828_vm0, %v873_v32, %v869_v35 }
 0x2ce   : > { %v807_v54 = vpop.permute.xlu1 %806  ;;  %v902_v53 = vsel %vm901_vm5, %v874_v1, %v900_v4 }
 0x2cf   : > { %v878_v52 = vrot.slane %v807_v54, %v3144_v60 }
 0x2d1   : > { %v883_v57 = vsel %vm828_vm0, %v882_v59, %v878_v52 }
 0x2d2   : > { %v813_v2 = vpop.permute.xlu1 %812  ;;  %v904_v32 = vsel %vm903_vm6, %v883_v57, %v902_v53 }
 0x2d3   : > { %v887_v63 = vrot.slane %v813_v2, %v3144_v60 }
 0x2d5   : > { %v892_v47 = vsel %vm828_vm0, %v891_v55, %v887_v63  ;;  %v3534_v63 = vsub.s32 3, %v3033_v51 }
 0x2d6   : > { %v906_v35 = vsel %vm905_vm7, %v892_v47, %v904_v32 }
 0x2d7   : > { %v909_v50 = vsel %vm908_vm8, %v906_v35, -inf }
 0x2d8   : > { %910 = vmax.xlane.f32.xlu1 %v909_v50 }
 0x365   : > { %v3181_v43 = vpop.xlane.xlu1 %910 }
 0x366   : > { %v916_v54 = vrot.slane %v3181_v43, %v3039_v56  ;;  %v920_v52 = vrot.slane %v3181_v43, %v919_v58  ;;  %v932_v59 = vrot.slane %v3181_v43, %v931_v44  ;;  %v3202_v57 = vrot.slane %v3181_v43, %v943_v0 }
 0x368   : > { %v953_v6 = vsub.f32 %v3103_v8, %v916_v54  ;;  %v954_v45 = vsub.f32 %v3097_v5, %v916_v54  ;;  %v955_v1 = vsub.f32 %v3094_v3, %v920_v52  ;;  %v962_v8 = vsub.f32 %v3111_v19, %v932_v59 }
 0x369   : > { %v924_v5 = vrot.slane %v3181_v43, %v923_v62  ;;  %v956_v2 = vsub.f32 %v3109_v9, %v920_v52  ;;  %v968_v3 = vsub.f32 %v3129_v39, %v3202_v57  ;;  %v928_v9 = vrot.slane %v3181_v43, %v3534_v63 }
 0x36a   : > { %v969_v48 = vmul.f32 1.442695, %v953_v6  ;;  %v971_v49 = vmul.f32 1.442695, %v954_v45  ;;  %v973_v4 = vmul.f32 1.442695, %v955_v1 }
 0x36b   : > { %v987_v55 = vmul.f32 1.442695, %v962_v8  ;;  %v957_v19 = vsub.f32 %v3115_v25, %v924_v5  ;;  %v975_v53 = vmul.f32 1.442695, %v956_v2  ;;  %v999_v32 = vmul.f32 1.442695, %v968_v3 }
 0x36c   : > { %2458 = vpow2.f32 %v969_v48  ;;  %v958_v35 = vsub.f32 %v3099_v7, %v924_v5  ;;  %v959_v25 = vsub.f32 %v3121_v36, %v928_v9  ;;  %v3533_v45 = vsub.s32 5, %v3033_v51 }
 0x36d   : > { %2460 = vpow2.f32 %v971_v49  ;;  %v977_v39 = vmul.f32 1.442695, %v957_v19  ;;  %v960_v7 = vsub.f32 %v3105_v10, %v928_v9  ;;  %v961_v49 = vsub.f32 %v3127_v38, %v932_v59 }
 0x36e   : > { %2462 = vpow2.f32 %v973_v4  ;;  %v979_v54 = vmul.f32 1.442695, %v958_v35  ;;  %v981_v48 = vmul.f32 1.442695, %v959_v25  ;;  %v936_v36 = vrot.slane %v3181_v43, %v3533_v45 }
 0x36f   : > { %2464 = vpow2.f32 %v987_v55  ;;  %v983_v8 = vmul.f32 1.442695, %v960_v7  ;;  %v3532_v10 = vsub.s32 6, %v3033_v51  ;;  %v985_v55 = vmul.f32 1.442695, %v961_v49 }
 0x370   : > { %2466 = vpow2.f32 %v975_v53  ;;  %v963_v4 = vsub.f32 %v3133_v40, %v936_v36  ;;  %v964_v59 = vsub.f32 %v3117_v30, %v936_v36  ;;  %v967_v30 = vsub.f32 %v3139_v42, %v3202_v57 }
 0x371   : > { %2468 = vpow2.f32 %v999_v32  ;;  %v940_v38 = vrot.slane %v3181_v43, %v3532_v10 }
 0x372   : > { %2470 = vpow2.f32 %v977_v39  ;;  %v989_v19 = vmul.f32 1.442695, %v963_v4  ;;  %v991_v32 = vmul.f32 1.442695, %v964_v59 }
 0x373   : > { %2472 = vpow2.f32 %v979_v54  ;;  %v965_v40 = vsub.f32 %v3136_v41, %v940_v38  ;;  %v966_v35 = vsub.f32 %v3123_v37, %v940_v38  ;;  %v997_v54 = vmul.f32 1.442695, %v967_v30 }
 0x374   : > { %2474 = vpow2.f32 %v981_v48 }
 0x375   : > { %2476 = vpow2.f32 %v983_v8  ;;  %v993_v43 = vmul.f32 1.442695, %v965_v40  ;;  %v995_v25 = vmul.f32 1.442695, %v966_v35 }
 0x376   : > { %v3212_v47 = vpop.eup %2458  ;;  %2478 = vpow2.f32 %v985_v55 }
 0x377   : > { %1018 = vperm.xlu0 %2456, %v3212_v47   ;;  %v3219_v50 = vpop.eup %2460  ;;  %2480 = vpow2.f32 %v989_v19 }
 0x378   : > { %v3223_v6 = vpop.eup %2462  ;;  %2482 = vpow2.f32 %v991_v32 }
 0x379   : > { %v3225_v52 = vpop.eup %2464  ;;  %2484 = vpow2.f32 %v993_v43 }
 0x37a   : > { %1045 = vperm.xlu1 %2455, %v3225_v52   ;;  %v3231_v1 = vpop.eup %2466  ;;  %2486 = vpow2.f32 %v995_v25 }
 0x37b   : > { %1021 = vperm.xlu0 %2456, %v3219_v50   ;;  %v3238_v5 = vpop.eup %2468  ;;  %2488 = vpow2.f32 %v997_v54 }
 0x37c   : > { %v3240_v2 = vpop.eup %2470 }
 0x37d   : > { %v3246_v3 = vpop.eup %2472 }
 0x37e   : > { %1063 = vperm.xlu1 %2455, %v3238_v5   ;;  %v3253_v53 = vpop.eup %2474 }
 0x37f   : > { %1024 = vperm.xlu0 %2456, %v3223_v6   ;;  %v3257_v9 = vpop.eup %2476 }
 0x380   : > { %v3261_v39 = vpop.eup %2478 }
 0x381   : > { %v3266_v41 = vpop.eup %2480 }
 0x382   : > { %v3269_v7 = vpop.eup %2482 }
 0x383   : > { %1027 = vperm.xlu0 %2456, %v3231_v1   ;;  %v3272_v37 = vpop.eup %2484 }
 0x384   : > { %v3275_v48 = vpop.eup %2486 }
 0x385   : > { %v3278_v42 = vpop.eup %2488 }
 0x387   : > { %1030 = vperm.xlu0 %2456, %v3240_v2  }
 0x38b   : > { %1033 = vperm.xlu0 %2456, %v3246_v3  }
 0x38f   : > { %1036 = vperm.xlu0 %2456, %v3253_v53  }
 0x393   : > { %1039 = vperm.xlu0 %2456, %v3257_v9  }
 0x397   : > { %1042 = vperm.xlu0 %2456, %v3261_v39  }
 0x39b   : > { %1048 = vperm.xlu0 %2456, %v3266_v41  }
 0x39f   : > { %1051 = vperm.xlu0 %2456, %v3269_v7  }
 0x3a3   : > { %1054 = vperm.xlu0 %2456, %v3272_v37  }
 0x3a7   : > { %1057 = vperm.xlu0 %2456, %v3275_v48  }
 0x3ab   : > { %1060 = vperm.xlu0 %2456, %v3278_v42  }
 0x3f6   : > { %v1019_v57 = vpop.permute.xlu0 %1018 }
 0x3f7   : > { %v1068_v15 = vrot.slane %v1019_v57, %v3144_v60 }
 0x3f9   : > { %v1046_v43 = vpop.permute.xlu1 %1045 }
 0x3fa   : > { %v1022_v36 = vpop.permute.xlu0 %1021 }
 0x3fb   : > { %v1072_v54 = vrot.slane %v1022_v36, %v3147_v61 }
 0x3fd   : > { %v1064_v57 = vpop.permute.xlu1 %1063 }
 0x3fe   : > { %v1025_v49 = vpop.permute.xlu0 %1024 }
 0x3ff   : > { %v1077_v31 = vrot.slane %v1025_v49, %v3144_v60  ;;  %v1073_v49 = vsel %vm828_vm0, %v1072_v54, %v1068_v15 }
 0x402   : > { %v1028_v8 = vpop.permute.xlu0 %1027 }
 0x403   : > { %v1081_v35 = vrot.slane %v1028_v8, %v3147_v61 }
 0x405   : > { %v1082_v10 = vsel %vm828_vm0, %v1081_v35, %v1077_v31 }
 0x406   : > { %v1031_v4 = vpop.permute.xlu0 %1030  ;;  %v1137_v31 = vsel %vm893_vm1, %v1082_v10, %v1073_v49 }
 0x407   : > { %v1086_v21 = vrot.slane %v1031_v4, %v3144_v60 }
 0x40a   : > { %v1034_v55 = vpop.permute.xlu0 %1033 }
 0x40b   : > { %v1090_v30 = vrot.slane %v1034_v55, %v3147_v61  ;;  %v1108_v55 = vrot.slane %v1046_v43, %v3147_v61 }
 0x40d   : > { %v1091_v36 = vsel %vm828_vm0, %v1090_v30, %v1086_v21 }
 0x40e   : > { %v1037_v38 = vpop.permute.xlu0 %1036  ;;  %v1138_v35 = vsel %vm895_vm2, %v1091_v36, %v1137_v31 }
 0x40f   : > { %v1095_v8 = vrot.slane %v1037_v38, %v3144_v60 }
 0x412   : > { %v1040_v59 = vpop.permute.xlu0 %1039 }
 0x413   : > { %v1099_v26 = vrot.slane %v1040_v59, %v3147_v61 }
 0x415   : > { %v1100_v59 = vsel %vm828_vm0, %v1099_v26, %v1095_v8 }
 0x416   : > { %v1043_v19 = vpop.permute.xlu0 %1042  ;;  %v1139_v43 = vsel %vm897_vm3, %v1100_v59, %v1138_v35 }
 0x417   : > { %v1104_v20 = vrot.slane %v1043_v19, %v3144_v60 }
 0x419   : > { %v1109_v38 = vsel %vm828_vm0, %v1108_v55, %v1104_v20 }
 0x41a   : > { %v1049_v40 = vpop.permute.xlu0 %1048 }
 0x41b   : > { %v1113_v4 = vrot.slane %v1049_v40, %v3144_v60  ;;  %v1135_v40 = vrot.slane %v1064_v57, %v3147_v61 }
 0x41e   : > { %v1052_v32 = vpop.permute.xlu0 %1051 }
 0x41f   : > { %v1117_v45 = vrot.slane %v1052_v32, %v3147_v61 }
 0x421   : > { %v1118_v21 = vsel %vm828_vm0, %v1117_v45, %v1113_v4 }
 0x422   : > { %v1055_v25 = vpop.permute.xlu0 %1054 }
 0x423   : > { %v1122_v32 = vrot.slane %v1055_v25, %v3144_v60 }
 0x426   : > { %v1058_v63 = vpop.permute.xlu0 %1057 }
 0x427   : > { %v1126_v19 = vrot.slane %v1058_v63, %v3147_v61  ;;  %v1140_v63 = vsel %vm899_vm4, %v1109_v38, %v1139_v43  ;;  %v2709_v38 = vmov 0.0|0.0  }
 0x428   : > { %v1141_v10 = vsel %vm901_vm5, %v1118_v21, %v1140_v63  ;;  %2357 = vmatprep.subr.bf16.mxu1 %v2709_v38 }
 0x429   : > { %v1127_v15 = vsel %vm828_vm0, %v1126_v19, %v1122_v32 }
 0x42a   : > { %v1061_v26 = vpop.permute.xlu0 %1060  ;;  %v1142_v25 = vsel %vm903_vm6, %v1127_v15, %v1141_v10 }
 0x42b   : > { %v1131_v30 = vrot.slane %v1061_v26, %v3144_v60 }
 0x42d   : > { %v1136_v20 = vsel %vm828_vm0, %v1135_v40, %v1131_v30  ;;  %v3558_v40 = vsub.s32 6, %v3033_v51 }
 0x42e   : > { %v1143_v54 = vsel %vm905_vm7, %v1136_v20, %v1142_v25 }
 0x42f   : > { %v1145_v45 = vsel %vm908_vm8, %v1143_v54, 0.0 }
 0x430   : > { %1146 = vadd.xlane.f32.xlu0 %v1145_v45 }
 0x4bd   : > { %v1147_v8 = vpop.xlane.xlu0 %1146 }
 0x4be   : > { %v1168_v55 = vrot.slane %v1147_v8, %v931_v44  ;;  %v1152_v36 = vrot.slane %v1147_v8, %v3039_v56  ;;  %v1180_v49 = vrot.slane %v1147_v8, %v943_v0  ;;  %v1156_v59 = vrot.slane %v1147_v8, %v919_v58 }
 0x4bf   : > { %v1160_v31 = vrot.slane %v1147_v8, %v923_v62  ;;  %v3556_v62 = vsub.s32 3, %v3033_v51  ;;  %v1176_v63 = vrot.slane %v1147_v8, %v3558_v40  ;;  %v3565_v40 = vpack.c.bf16 %v3010_v34, %v3007_v33 }
 0x4c0   : > { %2490 = vrcp.f32 %v1168_v55 }
 0x4c1   : > { %2492 = vrcp.f32 %v1152_v36  ;;  %v1164_v35 = vrot.slane %v1147_v8, %v3556_v62  ;;  %v3563_v62 = vpack.c.bf16 %v2994_v27, %v2989_v24 }
 0x4c2   : > { %2494 = vrcp.f32 %v1180_v49  ;;  %v3560_v49 = vpack.c.bf16 %v2970_v16, %v2965_v14 }
 0x4c3   : > { %2496 = vrcp.f32 %v1156_v59 }
 0x4c4   : > { %2498 = vrcp.f32 %v1160_v31 }
 0x4c5   : > { %2500 = vrcp.f32 %v1164_v35 }
 0x4ca   : > { %v2491_v4 = vpop.eup %2490 }
 0x4cb   : > { %v2493_v19 = vpop.eup %2492  ;;  %v1202_v57 = vmul.f32 %v2491_v4, %v3261_v39  ;;  %v2358_v39 = vpack.c.bf16 %v3015_v46, %v2955_v11  ;;  %v3557_v46 = vsub.s32 5, %v3033_v51 }
 0x4cc   : > { %v2495_v44 = vpop.eup %2494  ;;  %v1190_v56 = vmul.f32 %v2493_v19, %v3212_v47  ;;  %v1191_v58 = vmul.f32 %v2493_v19, %v3219_v50 }
 0x4cd   : > { %1254 = vperm.xlu0 %2456, %v1202_v57   ;;  %v1212_v0 = vmul.f32 %v2495_v44, %v3238_v5  ;;  %v2497_v32 = vpop.eup %2496  ;;  %2359 = vmatpush3.bf16.msra.mxu1 %v2358_v39  ;;  %v2711_v5 = vmov 0.0   ;;  %v3561_v57 = vpack.c.bf16 %v2976_v18, %v2973_v17  ;;  %v3562_v18 = vpack.c.bf16 %v2986_v23, %v2983_v22 }
 0x4ce   : > { %1230 = vperm.xlu1 %2455, %v1190_v56   ;;  %v1193_v47 = vmul.f32 %v2497_v32, %v3223_v6  ;;  %2273 = vmatprep.mubr.msk.f32.mxu1 %vm2710_vm9, %v2711_v5  ;;  %v1194_v50 = vmul.f32 %v2497_v32, %v3231_v1  ;;  %v2499_v21 = vpop.eup %2498  ;;  %v1172_v6 = vrot.slane %v1147_v8, %v3557_v46 }
 0x4cf   : > { %2360 = vmatprep.subr.bf16.mxu1 %v2709_v38  ;;  %v1196_v11 = vmul.f32 %v2499_v21, %v3240_v2  ;;  %v1197_v43 = vmul.f32 %v2499_v21, %v3246_v3  ;;  %v2501_v15 = vpop.eup %2500  ;;  %v1203_v2 = vmul.f32 %v2491_v4, %v3225_v52  ;;  %v3564_v21 = vpack.c.bf16 %v3000_v29, %v2997_v28 }
 0x4d0   : > { %2502 = vrcp.f32 %v1172_v6  ;;  %v1199_v26 = vmul.f32 %v2501_v15, %v3253_v53  ;;  %v1200_v1 = vmul.f32 %v2501_v15, %v3257_v9  ;;  %v1211_v9 = vmul.f32 %v2495_v44, %v3278_v42 }
 0x4d1   : > { %1275 = vperm.xlu0 %2456, %v1212_v0   ;;  %2504 = vrcp.f32 %v1176_v63 }
 0x4d2   : > { %1233 = vperm.xlu1 %2455, %v1191_v58  }
 0x4d6   : > { %1236 = vperm.xlu1 %2455, %v1193_v47  }
 0x4da   : > { %1239 = vperm.xlu1 %2455, %v1194_v50   ;;  %v2503_v30 = vpop.eup %2502 }
 0x4db   : > { %v1205_v10 = vmul.f32 %v2503_v30, %v3266_v41  ;;  %v1206_v3 = vmul.f32 %v2503_v30, %v3269_v7  ;;  %v2505_v20 = vpop.eup %2504 }
 0x4dc   : > { %v1208_v53 = vmul.f32 %v2505_v20, %v3272_v37  ;;  %v1209_v51 = vmul.f32 %v2505_v20, %v3275_v48  ;;  %v3559_v37 = vpack.c.bf16 %v2962_v13, %v2959_v12 }
 0x4de   : > { %1242 = vperm.xlu1 %2455, %v1196_v11  }
 0x4e2   : > { %1245 = vperm.xlu1 %2455, %v1197_v43  }
 0x4e6   : > { %1248 = vperm.xlu1 %2455, %v1199_v26  }
 0x4ea   : > { %1251 = vperm.xlu1 %2455, %v1200_v1  }
 0x4ee   : > { %1257 = vperm.xlu1 %2455, %v1203_v2  }
 0x4f2   : > { %1260 = vperm.xlu1 %2455, %v1205_v10  }
 0x4f6   : > { %1263 = vperm.xlu1 %2455, %v1206_v3  }
 0x4fa   : > { %1266 = vperm.xlu1 %2455, %v1208_v53  }
 0x4fe   : > { %1269 = vperm.xlu1 %2455, %v1209_v51  }
 0x502   : > { %1272 = vperm.xlu1 %2455, %v1211_v9  }
 0x54c   : > { %v1255_v44 = vpop.permute.xlu0 %1254 }
 0x54d   : > { %v1231_v25 = vpop.permute.xlu1 %1230  ;;  %v1316_v58 = vrot.slane %v1255_v44, %v3144_v60 }
 0x54e   : > { %v1280_v54 = vrot.slane %v1231_v25, %v3144_v60 }
 0x550   : > { %v1276_v46 = vpop.permute.xlu0 %1275 }
 0x551   : > { %v1234_v52 = vpop.permute.xlu1 %1233 }
 0x552   : > { %v1284_v41 = vrot.slane %v1234_v52, %v3147_v61 }
 0x554   : > { %v1285_v45 = vsel %vm828_vm0, %v1284_v41, %v1280_v54 }
 0x555   : > { %2274 = vmatmul.mubr.msk.f32.vlgmr.msra.gmra.mrb[0].mxu1 %vm908_vm8, %v1285_v45  ;;  %v1237_v7 = vpop.permute.xlu1 %1236 }
 0x556   : > { %2362 = vmatpush3.bf16.msra.mxu1 %v3559_v37  ;;  %2280 = vmatprep.mubr.msk.f32.mxu1 %vm2710_vm9, %v2711_v5  ;;  %v1289_v42 = vrot.slane %v1237_v7, %v3144_v60 }
 0x557   : > { %2363 = vmatprep.subr.bf16.mxu1 %v2709_v38 }
 0x559   : > { %v1240_v48 = vpop.permute.xlu1 %1239 }
 0x55a   : > { %v1293_v8 = vrot.slane %v1240_v48, %v3147_v61 }
 0x55c   : > { %v1294_v55 = vsel %vm828_vm0, %v1293_v8, %v1289_v42 }
 0x55d   : > { %2281 = vmatmul.mubr.msk.f32.vlgmr.msra.gmra.mrb[2].mxu1 %vm908_vm8, %v1294_v55  ;;  %v1243_v36 = vpop.permute.xlu1 %1242  ;;  %v1349_v6 = vsel %vm893_vm1, %v1294_v55, %v1285_v45 }
 0x55e   : > { %2365 = vmatpush3.bf16.msra.mxu1 %v3560_v49  ;;  %2287 = vmatprep.mubr.msk.f32.mxu1 %vm2710_vm9, %v2711_v5  ;;  %v1298_v13 = vrot.slane %v1243_v36, %v3144_v60 }
 0x55f   : > { %2366 = vmatprep.subr.bf16.mxu1 %v2709_v38 }
 0x561   : > { %v1246_v12 = vpop.permute.xlu1 %1245 }
 0x562   : > { %v1302_v59 = vrot.slane %v1246_v12, %v3147_v61 }
 0x564   : > { %v1303_v4 = vsel %vm828_vm0, %v1302_v59, %v1298_v13 }
 0x565   : > { %2288 = vmatmul.mubr.msk.f32.vlgmr.msra.gmra.mrb[4].mxu1 %vm908_vm8, %v1303_v4  ;;  %v1249_v19 = vpop.permute.xlu1 %1248  ;;  %v1350_v43 = vsel %vm895_vm2, %v1303_v4, %v1349_v6 }
 0x566   : > { %2368 = vmatpush3.bf16.msra.mxu1 %v3561_v57  ;;  %2294 = vmatprep.mubr.msk.f32.mxu1 %vm2710_vm9, %v2711_v5  ;;  %v1307_v16 = vrot.slane %v1249_v19, %v3144_v60 }
 0x567   : > { %2369 = vmatprep.subr.bf16.mxu1 %v2709_v38 }
 0x569   : > { %v1252_v14 = vpop.permute.xlu1 %1251 }
 0x56a   : > { %v1311_v31 = vrot.slane %v1252_v14, %v3147_v61 }
 0x56c   : > { %v1312_v56 = vsel %vm828_vm0, %v1311_v31, %v1307_v16 }
 0x56d   : > { %2295 = vmatmul.mubr.msk.f32.vlgmr.msra.gmra.mrb[6].mxu1 %vm908_vm8, %v1312_v56  ;;  %v1258_v0 = vpop.permute.xlu1 %1257  ;;  %v1351_v28 = vsel %vm897_vm3, %v1312_v56, %v1350_v43 }
 0x56e   : > { %v1320_v17 = vrot.slane %v1258_v0, %v3147_v61  ;;  %2371 = vmatpush3.bf16.msra.mxu1 %v3562_v18  ;;  %2301 = vmatprep.mubr.msk.f32.mxu1 %vm2710_vm9, %v2711_v5 }
 0x56f   : > { %2372 = vmatprep.subr.bf16.mxu1 %v2709_v38 }
 0x570   : > { %v1321_v32 = vsel %vm828_vm0, %v1320_v17, %v1316_v58 }
 0x571   : > { %2302 = vmatmul.mubr.msk.f32.vlgmr.msra.gmra.mrb[8].mxu1 %vm908_vm8, %v1321_v32  ;;  %v1261_v39 = vpop.permute.xlu1 %1260  ;;  %v1352_v26 = vsel %vm899_vm4, %v1321_v32, %v1351_v28 }
 0x572   : > { %2374 = vmatpush3.bf16.msra.mxu1 %v3563_v62  ;;  %2308 = vmatprep.mubr.msk.f32.mxu1 %vm2710_vm9, %v2711_v5  ;;  %v1325_v23 = vrot.slane %v1261_v39, %v3144_v60 }
 0x573   : > { %2375 = vmatprep.subr.bf16.mxu1 %v2709_v38 }
 0x575   : > { %v1264_v22 = vpop.permute.xlu1 %1263 }
 0x576   : > { %v1329_v35 = vrot.slane %v1264_v22, %v3147_v61 }
 0x578   : > { %v1330_v47 = vsel %vm828_vm0, %v1329_v35, %v1325_v23 }
 0x579   : > { %2309 = vmatmul.mubr.msk.f32.vlgmr.msra.gmra.mrb[10].mxu1 %vm908_vm8, %v1330_v47  ;;  %v1267_v50 = vpop.permute.xlu1 %1266  ;;  %v1353_v1 = vsel %vm901_vm5, %v1330_v47, %v1352_v26 }
 0x57a   : > { %2377 = vmatpush3.bf16.msra.mxu1 %v3564_v21  ;;  %2315 = vmatprep.mubr.msk.f32.mxu1 %vm2710_vm9, %v2711_v5  ;;  %v1334_v27 = vrot.slane %v1267_v50, %v3144_v60 }
 0x57b   : > { %2378 = vmatprep.subr.bf16.mxu1 %v2709_v38  ;;  %v1347_v38 = vrot.slane %v1276_v46, %v3147_v61 }
 0x57d   : > { %v1270_v24 = vpop.permute.xlu1 %1269 }
 0x57e   : > { %v1338_v11 = vrot.slane %v1270_v24, %v3147_v61 }
 0x580   : > { %v1339_v15 = vsel %vm828_vm0, %v1338_v11, %v1334_v27 }
 0x581   : > { %2316 = vmatmul.mubr.msk.f32.vlgmr.msra.gmra.mrb[12].mxu1 %vm908_vm8, %v1339_v15  ;;  %v1273_v29 = vpop.permute.xlu1 %1272  ;;  %v1354_v2 = vsel %vm903_vm6, %v1339_v15, %v1353_v1 }
 0x582   : > { %2380 = vmatpush3.bf16.msra.mxu1 %v3565_v40  ;;  %v1343_v63 = vrot.slane %v1273_v29, %v3144_v60  ;;  %2322 = vmatprep.mubr.msk.f32.mxu1 %vm2710_vm9, %v2711_v5 }
 0x584   : > { %v1348_v30 = vsel %vm828_vm0, %v1347_v38, %v1343_v63 }
 0x585   : > { %v1355_v61 = vsel %vm905_vm7, %v1348_v30, %v1354_v2  ;;  %2323 = vmatmul.mubr.msk.f32.vlgmr.msra.gmra.mrb[14].mxu1 %vm908_vm8, %v1348_v30 }
 0x586   : > { %1357 = vst.msk [vmem:[%s358_s10] sm:$0xff] %vm908_vm8, %v1355_v61 }
 0x587   : > { %2607 = shalt.err (!%p2604_p2)
}
 0x588   : > { %s2608_s30 = scalar_lea.hbm %s3438_s14, 128  ;;  %s2612_s12 = scalar_lea.hbm %s3522_s7, 256 }
 0x589   : > { %p2609_p6 = scmp.ne.s32.totalorder %s3438_s14, %s2608_s30  ;;  %p2613_p12 = scmp.lt.u32.totalorder %s3438_s14, %s3522_s7 }
 0x58a   : > { %p2614_p11 = scmp.lt.u32.totalorder %s2612_s12, %s2608_s30  ;;  %p2616_p10 = scmp.lt.u32.totalorder %s2608_s30, %s3438_s14 }
 0x58b   : > { %p2610_p8 = pnand %p2609_p6, %p3566_p13 }
 0x58c   : > { %p2615_p0 = por %p2614_p11, %p2613_p12 }
 0x58d   : > { %p2611_p4 = pneg %p2610_p8 }
 0x58e   : > { %p2617_p3 = por %p2616_p10, %p2615_p0 }
 0x590   : > { %p2618_p7 = pnand %p2617_p3, %p2611_p4 }
 0x592   : > { %2621 = shalt.err (!%p2618_p7)
}
 0x593   : > { %2390 = dma.vmem_to_hbm [thread:$0]  (%p3566_p13), %s1991_s20, 128, %s3438_s14, %s1964_s17  }
 0x594   : > { %s351_s10 = scalar_lea.vmem [#allocation8], %s2943_s26  ;;  %s3470_s20 = scalar_lea.hbm %s3521_s6, %s2152_s0 }
 0x595   : > { %s1977_s18 = sshll.u32 %s351_s10, 4  ;;  %s1959_s17 = scalar_lea.sflag [#allocation4], %s2931_s13  ;;  %s3472_s18 = int_to_ptr.vmem [resolvable:$true] %s1977_s18 }
 0x596   : > { %s2622_s26 = scalar_lea.vmem %s3472_s18, 128  ;;  %s2713_s28 = smov [#allocation8]  }
 0x597   : > { %p2623_p9 = scmp.ne.s32.totalorder %s3472_s18, %s2622_s26  ;;  %s2626_s21 = sshll.u32 %s2713_s28, 4  ;;  %s2627_s21 = int_to_ptr.vmem [resolvable:$false] %s2626_s21 }
 0x598   : > { %s2628_s2 = scalar_lea.vmem %s2627_s21, 256  ;;  %p2629_p2 = scmp.lt.s32.totalorder %s3472_s18, %s2627_s21 }
 0x599   : > { %p2624_p1 = pnand %p2623_p9, %p3566_p13  ;;  %p2630_p6 = scmp.lt.s32.totalorder %s2628_s2, %s2622_s26 }
 0x59b   : > { %p2625_p5 = pneg %p2624_p1  ;;  %p2631_p8 = por %p2630_p6, %p2629_p2 }
 0x59d   : > { %p2632_p4 = pnand %p2631_p8, %p2625_p5 }
 0x628   : > { %v1426_v33 = vpop.f32.mrb[0].mxu1 }
 0x629   : > { %v2275_v34 = vpop.f32.mrb[1].mxu1 }
 0x630   : > { %v1498_v60 = vpop.f32.mrb[2].mxu1 }
 0x631   : > { %v1942_v5 = vrot.slane %v1498_v60, 7  ;;  %v2282_v10 = vpop.f32.mrb[3].mxu1 }
 0x633   : > { %v1943_v3 = vsel %vm893_vm1, %v1942_v5, %v1426_v33 }
 0x638   : > { %v1570_v20 = vpop.f32.mrb[4].mxu1 }
 0x639   : > { %v1944_v53 = vrot.slane %v1570_v20, 6  ;;  %v2289_v51 = vpop.f32.mrb[5].mxu1 }
 0x63b   : > { %v1945_v9 = vsel %vm895_vm2, %v1944_v53, %v1943_v3 }
 0x640   : > { %v1642_v25 = vpop.f32.mrb[6].mxu1 }
 0x641   : > { %v1946_v52 = vrot.slane %v1642_v25, 5  ;;  %v2296_v54 = vpop.f32.mrb[7].mxu1 }
 0x643   : > { %v1947_v41 = vsel %vm897_vm3, %v1946_v52, %v1945_v9 }
 0x644   : > { %v1714_v45 = vpop.f32.mrb[8].mxu1 }
 0x645   : > { %v1948_v7 = vrot.slane %v1714_v45, 4  ;;  %v2303_v37 = vpop.f32.mrb[9].mxu1 }
 0x647   : > { %v1949_v48 = vsel %vm899_vm4, %v1948_v7, %v1947_v41 }
 0x64c   : > { %v1786_v42 = vpop.f32.mrb[10].mxu1 }
 0x64d   : > { %v1950_v8 = vrot.slane %v1786_v42, 3  ;;  %v2310_v55 = vpop.f32.mrb[11].mxu1 }
 0x64f   : > { %v1951_v36 = vsel %vm901_vm5, %v1950_v8, %v1949_v48 }
 0x654   : > { %v1858_v49 = vpop.f32.mrb[12].mxu1 }
 0x655   : > { %v1952_v12 = vrot.slane %v1858_v49, 2  ;;  %v2317_v13 = vpop.f32.mrb[13].mxu1 }
 0x657   : > { %v1953_v59 = vsel %vm903_vm6, %v1952_v12, %v1951_v36 }
 0x658   : > { %v1930_v4 = vpop.f32.mrb[14].mxu1 }
 0x659   : > { %v1954_v19 = vrot.slane %v1930_v4, 1  ;;  %v2324_v57 = vpop.f32.mrb[15].mxu1 }
 0x65b   : > { %v1955_v14 = vsel %vm905_vm7, %v1954_v19, %v1953_v59 }
 0x65c   : > { %1957 = vst [vmem:[%s351_s10] sm:$0xff] %v1955_v14 }
 0x65d   : > { %2635 = shalt.err (!%p2632_p4)
}
 0x65e   : > { %s2636_s13 = scalar_lea.hbm %s3470_s20, 128  ;;  %s2640_s16 = scalar_lea.hbm %s3521_s6, 256 }
 0x65f   : > { %p2637_p12 = scmp.ne.s32.totalorder %s3470_s20, %s2636_s13  ;;  %p2641_p10 = scmp.lt.u32.totalorder %s3470_s20, %s3521_s6 }
 0x660   : > { %p2642_p3 = scmp.lt.u32.totalorder %s2640_s16, %s2636_s13  ;;  %p2644_p9 = scmp.lt.u32.totalorder %s2636_s13, %s3470_s20 }
 0x661   : > { %p2638_p11 = pnand %p2637_p12, %p3566_p13 }
 0x662   : > { %p2643_p7 = por %p2642_p3, %p2641_p10 }
 0x663   : > { %p2639_p0 = pneg %p2638_p11 }
 0x664   : > { %p2645_p1 = por %p2644_p9, %p2643_p7 }
 0x666   : > { %p2646_p5 = pnand %p2645_p1, %p2639_p0 }
 0x668   : > { %2649 = shalt.err (!%p2646_p5)
}
 0x669   : > { %2389 = dma.vmem_to_hbm [thread:$0]  (%p3566_p13), %s3472_s18, 128, %s3470_s20, %s1959_s17  }
 0x66a PF: > { %s2002_s29 = sand.u32 1, %s2688_s24   ;;  %p3567_p2 = scmp.ne.s32.totalorder %s3539_s8, 0 }
 0x66b   : > { %p3568_p6 = scmp.ge.s32.totalorder %s2700_s27, 2  ;;  %s2003_s12 = scalar_lea.sflag [#allocation4], %s2002_s29 }
 0x66d   : > { %p2405_p8 = pnand %p3568_p6, %p3567_p2 }
 0x66f   : > { %2679 = dma.done.wait (!%p2405_p8), %s2003_s12, 128  }
 0x670   : > { %2681 = vsyncadd (!%p2405_p8), %s2003_s12, 4294967168  ;;  %s2012_s15 = scalar_lea.sflag [#allocation10], %s2002_s29 }
 0x671   : > { %2683 = dma.done.wait (!%p2405_p8), %s2012_s15, 128  }
 0x672   : > { %2685 = vsyncadd (!%p2405_p8), %s2012_s15, 4294967168  ;;  %s3569_s27 = sld [smem:[#allocation17_spill]]  ;;  %s3570_s19 = sld [smem:[#allocation16_spill]] }
 0x673   : > { %s3571_s26 = sld [smem:[#allocation18_spill]]  ;;  %s3572_s24 = smov %s2692_s25 }
 0x678   : > { %p27_p13 = scmp.ge.s32.totalorder %s3569_s27, 4   ;;  %s3573_s25 = smov %s3570_s19 }
 0x67a   :  { %29 = sbr.rel (!%p27_p13) target bundleno = 12 (0xc), region = 123 }
 0x681   :  { %2017 = vsyncpa [#allocation3], 1 }
 0x682   :  { %2019 = vsyncpa [#allocation3 + $0x1], 1 }
 0x683   :  { %2020 = vsyncpa [#allocation6], 1 }
 0x684   :  { %2022 = vsyncpa [#allocation6 + $0x1], 1 }
 0x685   :  { %2023 = vsyncpa [#allocation4], 1 }
 0x686   :  { %2025 = vsyncpa [#allocation4 + $0x1], 1 }
 0x687   :  { %2026 = vsyncpa [#allocation10], 1 }
 0x688   :  { %2028 = vsyncpa [#allocation10 + $0x1], 1 }

// kernel: tpu_custom_call.1
= control target key start
LH: loop header
LB: loop body
LE: loop exit
PB: predicated region body
PF: predicated region fallthrough
CT: control target
= control target key end

     0   :  { %s3515_s0 = inlined_call_operand.hbm [shape: f32[256,128], index: 0, kind: input, shape index: {}]   ;;  %s3516_s1 = inlined_call_operand.hbm [shape: f32[16,128], index: 1, kind: input, shape index: {}]   ;;  %s3517_s2 = inlined_call_operand.hbm [shape: f32[128,128], index: 2, kind: input, shape index: {}]   ;;  %s3518_s3 = inlined_call_operand.vmem [shape: f32[1,128], index: 3, kind: input, shape index: {}]   ;;  %s3519_s4 = inlined_call_operand.vmem [shape: f32[1,128], index: 4, kind: input, shape index: {}]   ;;  %s3520_s5 = inlined_call_operand.vmem [shape: f32[1,16], index: 5, kind: input, shape index: {}]   ;;  %s3521_s6 = inlined_call_operand.hbm [shape: f32[16,128], index: 6, kind: output, shape index: {0}]   ;;  %s3522_s7 = inlined_call_operand.hbm [shape: f32[16,16], index: 7, kind: output, shape index: {1}]  }
   0x1   :  { %3535 = sst [smem:[#allocation19_spill]] %s3515_s0 }
   0x2   :  { %3536 = sst [smem:[#allocation20_spill]] %s3517_s2 }
   0x3   :  { %13 = vsyncpa [#allocation3], 0 }
   0x4   :  { %15 = vsyncpa [#allocation3 + $0x1], 0 }
   0x5   :  { %16 = vsyncpa [#allocation6], 0 }
   0x6   :  { %18 = vsyncpa [#allocation6 + $0x1], 0 }
   0x7   :  { %19 = vsyncpa [#allocation4], 0 }
   0x8   :  { %21 = vsyncpa [#allocation4 + $0x1], 0 }
   0x9   :  { %22 = vsyncpa [#allocation10], 0 }
   0xa   :  { %24 = vsyncpa [#allocation10 + $0x1], 0  ;;  %s2754_s24 = smov 0   ;;  %s2756_s25 = smov 0  }
   0xb   :  { %s2758_s26 = smov 0   ;;  %s2760_s27 = smov 0  }
   0xc LB: > { %3537 = sst [smem:[#allocation16_spill]] %s2696_s26  ;;  %s2775_s28 = sadd.s32 4294967295, %s2700_s27   ;;  %s2700_s27 = sphi %s2760_s27, %s3569_s27   ;;  %s2696_s26 = sphi %s2758_s26, %s3571_s26   ;;  %s2692_s25 = sphi %s2756_s25, %s3573_s25   ;;  %s2688_s24 = sphi %s2754_s24, %s3572_s24  }
   0xd   : > { %s2124_s29 = sadd.s32 4294967294, %s2700_s27   ;;  %p50_p0 = scmp.ne.s32.totalorder %s2692_s25, %s2688_s24 }
   0xe   : > { %p3523_p1 = scmp.eq.s32.totalorder %s2775_s28, 0  ;;  %p190_p3 = scmp.eq.s32.totalorder %s2124_s29, 1 }
   0xf   : > { %p2125_p5 = scmp.ge.s32.totalorder %s2700_s27, 1  ;;  %p223_p7 = scmp.lt.s32.totalorder %s2700_s27, 3 }
  0x10   : > { %p2784_p4 = por %p3523_p1, %p50_p0  ;;  %p2789_p6 = por %p190_p3, %p50_p0 }
  0x11   : > { %p2794_p8 = pnand %p2125_p5, %p223_p7  ;;  %s2702_s10 = smov [#allocation7]  }
  0x12   : > { %s3538_s30 = scalar_select %p2784_p4, 1, 0 }
  0x13   : > { %s3539_s8 = scalar_select %p2789_p6, 1, 0 }
  0x14   : > { %s3540_s9 = scalar_select %p2794_p8, 1, 0 }
  0x15   : > { %s235_s11 = sshll.u32 %s2702_s10, 4  ;;  %p2393_p9 = pneg %p2794_p8  ;;  %s2798_s11 = int_to_ptr.vmem [resolvable:$true] %s235_s11 }
  0x16   : > { %s2810_s13 = sadd.s32 1, %s2700_s27   ;;  %s37_s14 = sadd.s32 1, %s2696_s26 }
  0x17   : > { %p2805_p11 = pnand %p2393_p9, %p3523_p1  ;;  %3542 = sst [smem:[#allocation17_spill]] %s2810_s13 }
  0x18   : > { %s34_s15 = ssub.s32 %s2700_s27, %s2810_s13  ;;  %s3543_s2 = sld [smem:[#allocation20_spill]] }
  0x19   : > { %p2508_p13 = pneg %p2805_p11 }
  0x1e   : > { %s2506_s18 = scalar_lea.hbm %s3543_s2, 2048 }
  0x1f   : > { %p2507_p12 = scmp.ne.s32.totalorder %s3543_s2, %s2506_s18  ;;  %p2513_p5 = scmp.lt.u32.totalorder %s2506_s18, %s3543_s2 }
  0x21   : > { %p2509_p0 = pnand %p2508_p13, %p2507_p12 }
  0x23   : > { %p2510_p3 = pneg %p2509_p0 }
  0x25   : > { %p2515_p7 = pnand %p2513_p5, %p2510_p3 }
  0x27   : > { %2518 = shalt.err (!%p2515_p7)
}
  0x28   : > { %s2519_s23 = scalar_lea.vmem %s2798_s11, 2048  ;;  %p2527_p2 = scmp.lt.s32.totalorder %s2798_s11, %s2798_s11 }
  0x29   : > { %p2520_p9 = scmp.ne.s32.totalorder %s2798_s11, %s2519_s23  ;;  %p2528_p6 = scmp.lt.s32.totalorder %s2519_s23, %s2519_s23 }
  0x2b   : > { %p2522_p10 = pnand %p2520_p9, %p2508_p13  ;;  %p2529_p4 = por %p2528_p6, %p2527_p2 }
  0x2d   : > { %p2523_p1 = pneg %p2522_p10 }
  0x2f   : > { %p2530_p8 = pnand %p2529_p4, %p2523_p1 }
  0x31   : > { %2533 = shalt.err (!%p2530_p8)
}
  0x32   : > { %s3526_s29 = smov 128   ;;  %s3527_s10 = smov 8  }
  0x33   : > { %2396 = dma.hbm_to_vmem [thread:$0]  (!%p2805_p11), %s3543_s2, 2048, %s2798_s11, [#allocation6], %s3526_s29, %s3526_s29, %s3527_s10  }
  0x34   : > { %p35_p1 = scmp.eq.s32.totalorder %s34_s15, 0  ;;  %p44_p2 = scmp.ne.s32.totalorder %s2696_s26, %s2692_s25 }
  0x35   : > { %p45_p4 = scmp.eq.s32.totalorder %s2700_s27, 0  ;;  %p2412_p6 = scmp.lt.s32.totalorder %s2700_s27, 2 }
  0x36   : > { %s2844_s18 = scalar_select %p35_p1, %s2696_s26, %s37_s14  }
  0x37   : > { %p46_p8 = por %p45_p4, %p44_p2  ;;  %p3545_p10 = scmp.eq.s32.totalorder %s2775_s28, 1 }
  0x38   : > { %3544 = sst [smem:[#allocation18_spill]] %s2844_s18  ;;  %s2853_s12 = sand.u32 1, %s2696_s26  }
  0x39   : > { %p2848_p12 = por %p3545_p10, %p44_p2  ;;  %s2156_s20 = sshll.u32 %s2700_s27, 11 }
  0x3a   : > { %s2128_s21 = sshll.u32 %s2853_s12, 7  ;;  %s3547_s0 = sld [smem:[#allocation19_spill]] }
  0x3b   : > { %s3546_s19 = scalar_select %p2848_p12, 1, 0 }
  0x3c   : > { %s262_s14 = scalar_lea.vmem [#allocation2], %s2128_s21  ;;  %p2862_p11 = pnand %p2412_p6, %p46_p8 }
  0x3d   : > { %s269_s23 = sshll.u32 %s262_s14, 4  ;;  %s259_s29 = scalar_lea.sflag [#allocation3], %s2853_s12  ;;  %s2866_s23 = int_to_ptr.vmem [resolvable:$true] %s269_s23 }
  0x3e   : > { %p2536_p0 = pneg %p2862_p11 }
  0x40   : > { %s2860_s15 = scalar_lea.hbm %s3547_s0, %s2156_s20  ;;  %s2539_s11 = scalar_lea.hbm %s3547_s0, 4096 }
  0x41   : > { %s2534_s10 = scalar_lea.hbm %s2860_s15, 2048  ;;  %p2540_p7 = scmp.lt.u32.totalorder %s2860_s15, %s3547_s0 }
  0x42   : > { %p2535_p13 = scmp.ne.s32.totalorder %s2860_s15, %s2534_s10  ;;  %p2541_p9 = scmp.lt.u32.totalorder %s2539_s11, %s2534_s10 }
  0x43   : > { %p2543_p2 = scmp.lt.u32.totalorder %s2534_s10, %s2860_s15 }
  0x44   : > { %p2537_p3 = pnand %p2536_p0, %p2535_p13  ;;  %p2542_p1 = por %p2541_p9, %p2540_p7 }
  0x46   : > { %p2538_p5 = pneg %p2537_p3  ;;  %p2544_p4 = por %p2543_p2, %p2542_p1 }
  0x48   : > { %p2545_p6 = pnand %p2544_p4, %p2538_p5 }
  0x4a   : > { %2548 = shalt.err (!%p2545_p6)
}
  0x4b   : > { %s2549_s17 = scalar_lea.vmem %s2866_s23, 2048  ;;  %s2705_s20 = smov [#allocation2]  }
  0x4c   : > { %p2550_p8 = scmp.ne.s32.totalorder %s2866_s23, %s2549_s17  ;;  %s2554_s21 = sshll.u32 %s2705_s20, 4  ;;  %s2555_s21 = int_to_ptr.vmem [resolvable:$false] %s2554_s21 }
  0x4d   : > { %s2556_s22 = scalar_lea.vmem %s2555_s21, 4096  ;;  %p2557_p3 = scmp.lt.s32.totalorder %s2866_s23, %s2555_s21 }
  0x4e   : > { %p2552_p10 = pnand %p2550_p8, %p2536_p0  ;;  %p2558_p7 = scmp.lt.s32.totalorder %s2556_s22, %s2549_s17 }
  0x50   : > { %p2553_p13 = pneg %p2552_p10  ;;  %p2559_p9 = por %p2558_p7, %p2557_p3 }
  0x52   : > { %p2560_p1 = pnand %p2559_p9, %p2553_p13 }
  0x54   : > { %2563 = shalt.err (!%p2560_p1)
}
  0x55   : > { %s3549_s10 = smov 8   ;;  %s3550_s11 = smov 128  }
  0x56   : > { %2400 = dma.hbm_to_vmem [thread:$0]  (!%p2862_p11), %s2860_s15, 2048, %s2866_s23, %s259_s29, %s3550_s11, %s3550_s11, %s3549_s10  }
  0x57   : > { %s2131_s14 = sshll.u32 %s2853_s12, 3  ;;  %s2132_s20 = sshll.u32 %s2700_s27, 7 }
  0x58   : > { %s2905_s22 = scalar_lea.hbm %s3516_s1, %s2132_s20  ;;  %s283_s0 = scalar_lea.vmem [#allocation5], %s2131_s14 }
  0x59   : > { %s290_s2 = sshll.u32 %s283_s0, 4  ;;  %s3551_s18 = sand.u32 1, %s2700_s27   ;;  %s291_s2 = int_to_ptr.vmem [resolvable:$true] %s290_s2 }
  0x5a   : > { %s280_s26 = scalar_lea.sflag [#allocation6], %s3551_s18  ;;  %s2564_s13 = scalar_lea.hbm %s2905_s22, 128 }
  0x5b   : > { %p2565_p5 = scmp.ne.s32.totalorder %s2905_s22, %s2564_s13  ;;  %s2569_s15 = scalar_lea.hbm %s3516_s1, 256 }
  0x5c   : > { %p2570_p6 = scmp.lt.u32.totalorder %s2905_s22, %s3516_s1  ;;  %p2571_p8 = scmp.lt.u32.totalorder %s2569_s15, %s2564_s13 }
  0x5d   : > { %p2567_p2 = pnand %p2565_p5, %p2536_p0  ;;  %p2573_p13 = scmp.lt.u32.totalorder %s2564_s13, %s2905_s22 }
  0x5e   : > { %p2572_p10 = por %p2571_p8, %p2570_p6 }
  0x5f   : > { %p2568_p4 = pneg %p2567_p2 }
  0x60   : > { %p2574_p3 = por %p2573_p13, %p2572_p10 }
  0x62   : > { %p2575_p7 = pnand %p2574_p3, %p2568_p4 }
  0x64   : > { %2578 = shalt.err (!%p2575_p7)
}
  0x65   : > { %s2579_s0 = scalar_lea.vmem %s291_s2, 128  ;;  %s2706_s18 = smov [#allocation5]  }
  0x66   : > { %p2580_p9 = scmp.ne.s32.totalorder %s291_s2, %s2579_s0  ;;  %s2584_s11 = sshll.u32 %s2706_s18, 4  ;;  %s2585_s11 = int_to_ptr.vmem [resolvable:$false] %s2584_s11 }
  0x67   : > { %s2586_s14 = scalar_lea.vmem %s2585_s11, 256  ;;  %p2587_p2 = scmp.lt.s32.totalorder %s291_s2, %s2585_s11 }
  0x68   : > { %p2582_p1 = pnand %p2580_p9, %p2536_p0  ;;  %p2588_p12 = scmp.lt.s32.totalorder %s2586_s14, %s2579_s0 }
  0x6a   : > { %p2583_p5 = pneg %p2582_p1  ;;  %p2589_p6 = por %p2588_p12, %p2587_p2 }
  0x6c   : > { %p2590_p8 = pnand %p2589_p6, %p2583_p5 }
  0x6e   : > { %2593 = shalt.err (!%p2590_p8)
}
  0x6f   : > { %2403 = dma.hbm_to_vmem [thread:$0]  (!%p2862_p11), %s2905_s22, 128, %s291_s2, %s280_s26  }
  0x70   : > { %p3552_p4 = scmp.ne.s32.totalorder %s3540_s9, 0 }
  0x71   : > { %s2931_s13 = sand.u32 (!%p3552_p4), 1, %s2692_s25   ;;  %p3553_p12 = scmp.ne.s32.totalorder (!%p3552_p4), %s3538_s30, 0 }
  0x72   : > { %299 = sbr.rel (%p3552_p4) target bundleno = 1642 (0x66a), region = 44  ;;  %s2134_s20 = sshll.u32 (!%p3552_p4), %s2931_s13, 7 }
  0x73   : > { %s302_s17 = scalar_lea.sflag (!%p3552_p4), [#allocation3], %s2931_s13  ;;  %s2935_s21 = scalar_lea.vmem (!%p3552_p4), [#allocation2], %s2134_s20 }
  0x79   : > { %2667 = dma.done.wait (%p3553_p12), %s302_s17, 2048  }
  0x7a   : > { %2669 = vsyncadd (%p3553_p12), %s302_s17, 4294965248  ;;  %s310_s2 = sand.u32 1, %s2775_s28   ;;  %s2943_s26 = sshll.u32 %s2931_s13, 3 }
  0x7b   : > { %s311_s9 = scalar_lea.sflag [#allocation6], %s310_s2  ;;  %s314_s16 = scalar_lea.vmem [#allocation5], %s2943_s26 }
  0x7c   : > { %2671 = dma.done.wait (%p3553_p12), %s311_s9, 128  }
  0x7d   : > { %2673 = vsyncadd (%p3553_p12), %s311_s9, 4294967168  ;;  %p3554_p11 = scmp.eq.s32.totalorder %s2775_s28, 0 }
  0x7f   : > { %2675 = dma.done.wait (%p3554_p11), [#allocation6], 2048   ;;  %p3555_p0 = pmov %p3554_p11 }
  0x80   : > { %v376_v0 = vld [vmem:[#allocation7] sm:$0xff]  ;;  %v377_v1 = vld [vmem:[#allocation7 + $0x8] sm:$0xff]  ;;  %v378_v2 = vld [vmem:[#allocation7 + $0x10] sm:$0xff]  ;;  %v2707_v47 = vmov 1966171168   ;;  %v550_v49 = vlaneseq  ;;  %vm828_vm0 = vcmask 130112  }
  0x81   : > { %2677 = vsyncadd (%p3555_p0), [#allocation6], 4294965248  ;;  %v2325_v3 = vpack.c.bf16 %v377_v1, %v376_v0  ;;  %v379_v4 = vld [vmem:[#allocation7 + $0x18] sm:$0xff]  ;;  %v380_v6 = vld [vmem:[#allocation7 + $0x20] sm:$0xff]  ;;  %v548_v48 = vunpack.c.l.s4 %v2707_v47  ;;  %vm893_vm1 = vcmask 1041409   ;;  %vm895_vm2 = vcmask 1042434  }
  0x82   : > { %v2329_v5 = vpack.c.bf16 %v379_v4, %v378_v2  ;;  %v381_v7 = vld [vmem:[#allocation7 + $0x28] sm:$0xff]  ;;  %v382_v9 = vld [vmem:[#allocation7 + $0x30] sm:$0xff]  ;;  %v383_v10 = vld [vmem:[#allocation7 + $0x38] sm:$0xff]  ;;  %v3033_v51 = vshrl.u32 %v550_v49, 7  ;;  %vm897_vm3 = vcmask 1043459   ;;  %vm899_vm4 = vcmask 1044484  }
  0x83   : > { %2326 = vmatprep.subr.bf16.mxu0 %v2325_v3  ;;  %v2333_v8 = vpack.c.bf16 %v381_v7, %v380_v6  ;;  %v2955_v11 = vld [vmem:[%s2935_s21] sm:$0xff]  ;;  %v2959_v12 = vld [vmem:[%s2935_s21 + $0x10] sm:$0xff]  ;;  %v2962_v13 = vld [vmem:[%s2935_s21 + $0x18] sm:$0xff]  ;;  %v2337_v25 = vpack.c.bf16 %v383_v10, %v382_v9  ;;  %v549_v50 = vunpack.c.0.s8 %v548_v48  ;;  %vm901_vm5 = vcmask 1045509   ;;  %s358_s10 = scalar_lea.vmem [#allocation9], %s2943_s26  ;;  %s2152_s0 = sshll.u32 %s2775_s28, 7 }
  0x84   : > { %2328 = vmatpush3.bf16.msra.mxu0 %v2325_v3  ;;  %2245 = vmatprep.mubr.f32.mxu0 %v2955_v11  ;;  %v2965_v14 = vld [vmem:[%s2935_s21 + $0x20] sm:$0xff]  ;;  %v2970_v16 = vld [vmem:[%s2935_s21 + $0x28] sm:$0xff]  ;;  %v2973_v17 = vld [vmem:[%s2935_s21 + $0x30] sm:$0xff]  ;;  %v3039_v56 = vsub.s32 0, %v3033_v51  ;;  %vm903_vm6 = vcmask 1046534   ;;  %vm905_vm7 = vcmask 1047559   ;;  %s3438_s14 = scalar_lea.hbm %s3522_s7, %s2152_s0 }
  0x85   : > { %2330 = vmatprep.subr.bf16.mxu0 %v2329_v5  ;;  %v2976_v18 = vld [vmem:[%s2935_s21 + $0x38] sm:$0xff]  ;;  %v384_v19 = vld [vmem:[#allocation7 + $0x40] sm:$0xff]  ;;  %v2983_v22 = vld [vmem:[%s2935_s21 + $0x40] sm:$0xff]  ;;  %v552_v52 = vsub.s32 %v549_v50, %v3033_v51  ;;  %vm908_vm8 = vcmask 130048   ;;  %vm2710_vm9 = vmmov 0   ;;  %s1990_s20 = sshll.u32 %s358_s10, 4  ;;  %s1991_s20 = int_to_ptr.vmem [resolvable:$true] %s1990_s20 }
  0x86   : > { %v2986_v23 = vld [vmem:[%s2935_s21 + $0x48] sm:$0xff]  ;;  %v2989_v24 = vld [vmem:[%s2935_s21 + $0x50] sm:$0xff]  ;;  %v2994_v27 = vld [vmem:[%s2935_s21 + $0x58] sm:$0xff]  ;;  %s1964_s17 = scalar_lea.sflag [#allocation10], %s2931_s13  ;;  %p3566_p13 = scmp.ne.s32.totalorder %s3546_s19, 0 }
  0x87   : > { %v2997_v28 = vld [vmem:[%s2935_s21 + $0x60] sm:$0xff]  ;;  %v3000_v29 = vld [vmem:[%s2935_s21 + $0x68] sm:$0xff]  ;;  %v385_v30 = vld [vmem:[#allocation7 + $0x48] sm:$0xff]  ;;  %s2712_s2 = smov [#allocation9]  }
  0x88   : > { %2332 = vmatpush3.bf16.msra.mxu0 %v2329_v5  ;;  %v3007_v33 = vld [vmem:[%s2935_s21 + $0x70] sm:$0xff]  ;;  %v3010_v34 = vld [vmem:[%s2935_s21 + $0x78] sm:$0xff]  ;;  %v2341_v36 = vpack.c.bf16 %v385_v30, %v384_v19  ;;  %v386_v37 = vld [vmem:[#allocation7 + $0x50] sm:$0xff]  ;;  %s2598_s9 = sshll.u32 %s2712_s2, 4  ;;  %s2599_s9 = int_to_ptr.vmem [resolvable:$false] %s2598_s9 }
  0x89   : > { %2334 = vmatprep.subr.bf16.mxu0 %v2333_v8  ;;  %v387_v38 = vld [vmem:[#allocation7 + $0x58] sm:$0xff]  ;;  %v388_v40 = vld [vmem:[#allocation7 + $0x60] sm:$0xff]  ;;  %v389_v41 = vld [vmem:[#allocation7 + $0x68] sm:$0xff]  ;;  %p2601_p9 = scmp.lt.s32.totalorder %s1991_s20, %s2599_s9 }
  0x8a   : > { %v2345_v39 = vpack.c.bf16 %v387_v38, %v386_v37  ;;  %v2349_v42 = vpack.c.bf16 %v389_v41, %v388_v40  ;;  %v390_v43 = vld [vmem:[#allocation7 + $0x70] sm:$0xff]  ;;  %v391_v44 = vld [vmem:[#allocation7 + $0x78] sm:$0xff] }
  0x8b   : > { %v2353_v45 = vpack.c.bf16 %v391_v44, %v390_v43  ;;  %v3015_v46 = vld [vmem:[%s2935_s21 + $0x8] sm:$0xff]  ;;  %v3044_v58 = vld [vmem:[%s3518_s3] ss:$0 sm:$0xff]  ;;  %s2594_s21 = scalar_lea.vmem %s1991_s20, 128 }
  0x8c   : > { %2336 = vmatpush3.bf16.msra.mxu0 %v2333_v8  ;;  %v544_v53 = vld [vmem:[%s314_s16] sm:$0xff]  ;;  %p2595_p10 = scmp.ne.s32.totalorder %s1991_s20, %s2594_s21  ;;  %s2600_s16 = scalar_lea.vmem %s2599_s9, 256 }
  0x8d   : > { %2338 = vmatprep.subr.bf16.mxu0 %v2337_v25  ;;  %v553_v54 = vrot.slane %v544_v53, %v552_v52  ;;  %v3053_v6 = vld [vmem:[%s3519_s4] ss:$0 sm:$0xff]  ;;  %v546_v7 = vcombine.high %v544_v53, %v544_v53  ;;  %p2602_p1 = scmp.lt.s32.totalorder %s2600_s16, %s2594_s21 }
  0x8e   : > { %p2596_p3 = pnand %p2595_p10, %p3566_p13 }
  0x8f   : > { %v569_v55 = vrot.slane %v553_v54, %v552_v52  ;;  %v561_v57 = vcombine.high %v553_v54, %v553_v54  ;;  %v560_v41 = vrot.slane %v546_v7, %v552_v52  ;;  %p2603_p5 = por %p2602_p1, %p2601_p9 }
  0x90   : > { %2340 = vmatpush3.bf16.msra.mxu0 %v2337_v25  ;;  %p2597_p7 = pneg %p2596_p3 }
  0x91   : > { %2342 = vmatprep.subr.bf16.mxu0 %v2341_v36  ;;  %v598_v59 = vrot.slane %v569_v55, %v3039_v56  ;;  %v583_v60 = vrot.slane %v561_v57, %v552_v52  ;;  %v591_v5 = vcombine.high %v569_v55, %v569_v55 }
  0x92   : > { %p2604_p2 = pnand %p2603_p5, %p2597_p7 }
  0x93   : > { %v602_v1 = vrot.slane %v583_v60, %v3039_v56  ;;  %v593_v40 = vcombine.high %v583_v60, %v583_v60  ;;  %v562_v60 = vcombine.high %v560_v41, %v560_v41 }
  0x94   : > { %2344 = vmatpush3.bf16.msra.mxu0 %v2341_v36 }
  0x95   : > { %2346 = vmatprep.subr.bf16.mxu0 %v2345_v39  ;;  %v610_v57 = vrot.slane %v593_v40, %v3039_v56 }
  0x98   : > { %2348 = vmatpush3.bf16.msra.mxu0 %v2345_v39  ;;  %v606_v39 = vrot.slane %v591_v5, %v3039_v56 }
  0x99   : > { %2350 = vmatprep.subr.bf16.mxu0 %v2349_v42 }
  0x9c   : > { %2352 = vmatpush3.bf16.msra.mxu0 %v2349_v42 }
  0x9d   : > { %2354 = vmatprep.subr.bf16.mxu0 %v2353_v45 }
  0xa0   : > { %2356 = vmatpush3.bf16.msra.mxu0 %v2353_v45 }
  0xa3   : > { %2246 = vmatmul.mubr.f32.vlgmr.msra.gmra.mrb[0].mxu0 %v3015_v46 }
  0xa4   : > { %2248 = vmatprep.mubr.f32.mxu0 %v2959_v12 }
  0xa7   : > { %2249 = vmatmul.mubr.f32.gmra.mrb[2].mxu0 %v2962_v13 }
  0xa8   : > { %2251 = vmatprep.mubr.f32.mxu0 %v2965_v14 }
  0xab   : > { %2252 = vmatmul.mubr.f32.gmra.mrb[4].mxu0 %v2970_v16 }
  0xac   : > { %2254 = vmatprep.mubr.f32.mxu0 %v2973_v17 }
  0xaf   : > { %2255 = vmatmul.mubr.f32.gmra.mrb[6].mxu0 %v2976_v18 }
  0xb0   : > { %2257 = vmatprep.mubr.f32.mxu0 %v2983_v22 }
  0xb3   : > { %2258 = vmatmul.mubr.f32.gmra.mrb[8].mxu0 %v2986_v23 }
  0xb4   : > { %2260 = vmatprep.mubr.f32.mxu0 %v2989_v24 }
  0xb7   : > { %2261 = vmatmul.mubr.f32.gmra.mrb[10].mxu0 %v2994_v27 }
  0xb8   : > { %2263 = vmatprep.mubr.f32.mxu0 %v2997_v28 }
  0xbb   : > { %2264 = vmatmul.mubr.f32.gmra.mrb[12].mxu0 %v3000_v29 }
  0xbc   : > { %2266 = vmatprep.mubr.f32.mxu0 %v3007_v33 }
  0xbf   : > { %2267 = vmatmul.mubr.f32.gmra.mrb[14].mxu0 %v3010_v34 }
 0x176   : > { %v2247_v61 = vpop.f32.mrb[0].mxu0 }
 0x177   : > { %v471_v62 = vadd.f32 %v2247_v61, %v3044_v58  ;;  %v465_v63 = vpop.f32.mrb[1].mxu0 }
 0x178   : > { %v466_v0 = vadd.f32 %v3044_v58, %v465_v63 }
 0x179   : > { %v636_v2 = vadd.f32 %v598_v59, %v471_v62 }
 0x17a   : > { %v635_v3 = vadd.f32 %v598_v59, %v466_v0  ;;  %v2250_v4 = vpop.f32.mrb[2].mxu0  ;;  %v576_v59 = vrot.slane %v560_v41, %v552_v52 }
 0x17b   : > { %v481_v8 = vadd.f32 %v2250_v4, %v3044_v58  ;;  %v475_v9 = vpop.f32.mrb[3].mxu0  ;;  %v652_v10 = vmax.f32 %v636_v2, 0.0 }
 0x17c   : > { %v476_v19 = vadd.f32 %v3044_v58, %v475_v9  ;;  %v651_v25 = vmax.f32 %v635_v3, 0.0  ;;  %v614_v7 = vrot.slane %v576_v59, %v3039_v56  ;;  %v590_v9 = vrot.slane %v562_v60, %v552_v52 }
 0x17d   : > { %v675_v30 = vmul.f32 %v3053_v6, %v652_v10  ;;  %v638_v36 = vadd.f32 %v602_v1, %v481_v8 }
 0x17e   : > { %v637_v37 = vadd.f32 %v602_v1, %v476_v19  ;;  %v2253_v38 = vpop.f32.mrb[4].mxu0  ;;  %v674_v53 = vmul.f32 %v3053_v6, %v651_v25  ;;  %v618_v41 = vrot.slane %v590_v9, %v3039_v56 }
 0x17f   : > { %v491_v42 = vadd.f32 %v2253_v38, %v3044_v58  ;;  %692 = vadd.xlane.f32.xlu0 %v675_v30  ;;  %v485_v43 = vpop.f32.mrb[5].mxu0  ;;  %v654_v44 = vmax.f32 %v638_v36, 0.0 }
 0x180   : > { %v486_v45 = vadd.f32 %v3044_v58, %v485_v43  ;;  %v653_v47 = vmax.f32 %v637_v37, 0.0  ;;  %v592_v43 = vcombine.high %v576_v59, %v576_v59 }
 0x181   : > { %v640_v48 = vadd.f32 %v606_v39, %v491_v42  ;;  %v677_v50 = vmul.f32 %v3053_v6, %v654_v44 }
 0x182   : > { %v639_v54 = vadd.f32 %v606_v39, %v486_v45  ;;  %v2256_v55 = vpop.f32.mrb[6].mxu0  ;;  %v676_v3 = vmul.f32 %v3053_v6, %v653_v47 }
 0x183   : > { %v656_v61 = vmax.f32 %v640_v48, 0.0  ;;  %v501_v62 = vadd.f32 %v2256_v55, %v3044_v58  ;;  %696 = vadd.xlane.f32.xlu1 %v677_v50  ;;  %v495_v63 = vpop.f32.mrb[7].mxu0  ;;  %690 = vadd.xlane.f32.xlu0 %v674_v53 }
 0x184   : > { %v655_v0 = vmax.f32 %v639_v54, 0.0  ;;  %v496_v1 = vadd.f32 %v3044_v58, %v495_v63 }
 0x185   : > { %v642_v2 = vadd.f32 %v610_v57, %v501_v62  ;;  %v679_v30 = vmul.f32 %v3053_v6, %v656_v61  ;;  %v594_v61 = vcombine.high %v590_v9, %v590_v9 }
 0x186   : > { %v641_v4 = vadd.f32 %v610_v57, %v496_v1  ;;  %v2259_v5 = vpop.f32.mrb[8].mxu0  ;;  %v678_v8 = vmul.f32 %v3053_v6, %v655_v0  ;;  %v622_v57 = vrot.slane %v592_v43, %v3039_v56 }
 0x187   : > { %v658_v10 = vmax.f32 %v642_v2, 0.0  ;;  %v511_v19 = vadd.f32 %v2259_v5, %v3044_v58  ;;  %v505_v25 = vpop.f32.mrb[9].mxu0  ;;  %694 = vadd.xlane.f32.xlu1 %v676_v3 }
 0x188   : > { %v657_v36 = vmax.f32 %v641_v4, 0.0  ;;  %v506_v37 = vadd.f32 %v3044_v58, %v505_v25  ;;  %698 = vadd.xlane.f32.xlu0 %v678_v8 }
 0x189   : > { %v644_v38 = vadd.f32 %v614_v7, %v511_v19  ;;  %v681_v47 = vmul.f32 %v3053_v6, %v658_v10 }
 0x18a   : > { %v643_v39 = vadd.f32 %v614_v7, %v506_v37  ;;  %v2262_v40 = vpop.f32.mrb[10].mxu0  ;;  %v680_v42 = vmul.f32 %v3053_v6, %v657_v36  ;;  %v626_v7 = vrot.slane %v594_v61, %v3039_v56 }
 0x18b   : > { %v660_v52 = vmax.f32 %v644_v38, 0.0  ;;  %v521_v44 = vadd.f32 %v2262_v40, %v3044_v58  ;;  %v515_v45 = vpop.f32.mrb[11].mxu0  ;;  %700 = vadd.xlane.f32.xlu1 %v679_v30 }
 0x18c   : > { %v659_v48 = vmax.f32 %v643_v39, 0.0  ;;  %v516_v50 = vadd.f32 %v3044_v58, %v515_v45  ;;  %702 = vadd.xlane.f32.xlu0 %v680_v42 }
 0x18d   : > { %v646_v53 = vadd.f32 %v618_v41, %v521_v44  ;;  %v683_v0 = vmul.f32 %v3053_v6, %v660_v52  ;;  %v2708_v44 = vmov 0  }
 0x18e   : > { %v645_v54 = vadd.f32 %v618_v41, %v516_v50  ;;  %v2265_v55 = vpop.f32.mrb[12].mxu0  ;;  %v682_v60 = vmul.f32 %v3053_v6, %v659_v48  ;;  %2456 = vset.pattern.permute.xlu0 %v2708_v44  ;;  %2455 = vset.pattern.permute.xlu1 %v2708_v44 }
 0x18f   : > { %v662_v59 = vmax.f32 %v646_v53, 0.0  ;;  %v531_v62 = vadd.f32 %v2265_v55, %v3044_v58  ;;  %v525_v63 = vpop.f32.mrb[13].mxu0  ;;  %704 = vadd.xlane.f32.xlu1 %v681_v47 }
 0x190   : > { %v661_v1 = vmax.f32 %v645_v54, 0.0  ;;  %v526_v2 = vadd.f32 %v3044_v58, %v525_v63  ;;  %706 = vadd.xlane.f32.xlu0 %v682_v60 }
 0x191   : > { %v648_v3 = vadd.f32 %v622_v57, %v531_v62  ;;  %v685_v25 = vmul.f32 %v3053_v6, %v662_v59 }
 0x192   : > { %v647_v4 = vadd.f32 %v622_v57, %v526_v2  ;;  %v2268_v5 = vpop.f32.mrb[14].mxu0  ;;  %v684_v8 = vmul.f32 %v3053_v6, %v661_v1 }
 0x193   : > { %v664_v10 = vmax.f32 %v648_v3, 0.0  ;;  %v541_v9 = vadd.f32 %v2268_v5, %v3044_v58  ;;  %v535_v19 = vpop.f32.mrb[15].mxu0  ;;  %708 = vadd.xlane.f32.xlu1 %v683_v0 }
 0x194   : > { %v663_v30 = vmax.f32 %v647_v4, 0.0  ;;  %v536_v36 = vadd.f32 %v3044_v58, %v535_v19  ;;  %710 = vadd.xlane.f32.xlu0 %v684_v8  ;;  %v2141_v58 = vld [vmem:[%s3520_s5] ss:$0 sm:$0xff] }
 0x195   : > { %v650_v37 = vadd.f32 %v626_v7, %v541_v9  ;;  %v687_v41 = vmul.f32 %v3053_v6, %v664_v10 }
 0x196   : > { %v649_v38 = vadd.f32 %v626_v7, %v536_v36  ;;  %v686_v39 = vmul.f32 %v3053_v6, %v663_v30 }
 0x197   : > { %v666_v40 = vmax.f32 %v650_v37, 0.0  ;;  %712 = vadd.xlane.f32.xlu1 %v685_v25 }
 0x198   : > { %v665_v42 = vmax.f32 %v649_v38, 0.0  ;;  %714 = vadd.xlane.f32.xlu0 %v686_v39 }
 0x199   : > { %v689_v52 = vmul.f32 %v3053_v6, %v666_v40 }
 0x19a   : > { %v688_v43 = vmul.f32 %v3053_v6, %v665_v42 }
 0x19b   : > { %716 = vadd.xlane.f32.xlu1 %v687_v41 }
 0x19c   : > { %718 = vadd.xlane.f32.xlu0 %v688_v43 }
 0x19f   : > { %720 = vadd.xlane.f32.xlu1 %v689_v52 }
 0x1b0   : > { %733 = vbcast.lane.b32.xlu1 %v2141_v58, 264 }
 0x1b2   : > { %729 = vbcast.lane.b32.xlu0 %v2141_v58, 256 }
 0x20c   : > { %v693_v45 = vpop.xlane.xlu0 %692 }
 0x210   : > { %v697_v47 = vpop.xlane.xlu1 %696  ;;  %v691_v48 = vpop.xlane.xlu0 %690 }
 0x214   : > { %v695_v50 = vpop.xlane.xlu1 %694 }
 0x215   : > { %v699_v53 = vpop.xlane.xlu0 %698 }
 0x218   : > { %v701_v54 = vpop.xlane.xlu1 %700 }
 0x219   : > { %v703_v55 = vpop.xlane.xlu0 %702 }
 0x21c   : > { %v705_v57 = vpop.xlane.xlu1 %704 }
 0x21d   : > { %v707_v6 = vpop.xlane.xlu0 %706 }
 0x220   : > { %v709_v60 = vpop.xlane.xlu1 %708 }
 0x221   : > { %v711_v61 = vpop.xlane.xlu0 %710 }
 0x224   : > { %v713_v59 = vpop.xlane.xlu1 %712 }
 0x225   : > { %v715_v62 = vpop.xlane.xlu0 %714 }
 0x228   : > { %v717_v63 = vpop.xlane.xlu1 %716 }
 0x229   : > { %v719_v0 = vpop.xlane.xlu0 %718 }
 0x22c   : > { %v721_v1 = vpop.xlane.xlu1 %720 }
 0x22d   : > { %v730_v2 = vpop.permute.xlu0 %729 }
 0x22e   : > { %v3094_v3 = vadd.f32 %v730_v2, %v695_v50  ;;  %v3103_v8 = vadd.f32 %v730_v2, %v691_v48  ;;  %v3115_v25 = vadd.f32 %v730_v2, %v699_v53  ;;  %v3121_v36 = vadd.f32 %v730_v2, %v703_v55 }
 0x22f   : > { %v3127_v38 = vadd.f32 %v730_v2, %v707_v6  ;;  %v3133_v40 = vadd.f32 %v730_v2, %v711_v61  ;;  %v3136_v41 = vadd.f32 %v730_v2, %v715_v62  ;;  %v3139_v42 = vadd.f32 %v730_v2, %v719_v0 }
 0x230   : > { %v734_v4 = vpop.permute.xlu1 %733  ;;  %776 = vperm.xlu0 %2456, %v3094_v3   ;;  %v818_v53 = vand.u32 127, %v550_v49 }
 0x231   : > { %v3097_v5 = vadd.f32 %v734_v4, %v693_v45  ;;  %v3099_v7 = vadd.f32 %v734_v4, %v701_v54  ;;  %v3105_v10 = vadd.f32 %v734_v4, %v705_v57  ;;  %v3109_v9 = vadd.f32 %v734_v4, %v697_v47 }
 0x232   : > { %v3111_v19 = vadd.f32 %v734_v4, %v709_v60  ;;  %v3117_v30 = vadd.f32 %v734_v4, %v713_v59  ;;  %v3123_v37 = vadd.f32 %v734_v4, %v717_v63  ;;  %v3129_v39 = vadd.f32 %v734_v4, %v721_v1 }
 0x233   : > { %773 = vperm.xlu1 %2455, %v3097_v5   ;;  %v823_v55 = vadd.s32 4294967288, %v818_v53  ;;  %v3144_v60 = vsub.s32 %v818_v53, %v3033_v51 }
 0x234   : > { %785 = vperm.xlu0 %2456, %v3099_v7  }
 0x235   : > { %v3147_v61 = vsub.s32 %v823_v55, %v3033_v51 }
 0x237   : > { %770 = vperm.xlu1 %2455, %v3103_v8  }
 0x238   : > { %791 = vperm.xlu0 %2456, %v3105_v10  }
 0x23b   : > { %779 = vperm.xlu1 %2455, %v3109_v9  }
 0x23c   : > { %797 = vperm.xlu0 %2456, %v3111_v19  }
 0x23f   : > { %782 = vperm.xlu1 %2455, %v3115_v25  }
 0x240   : > { %803 = vperm.xlu0 %2456, %v3117_v30  }
 0x243   : > { %788 = vperm.xlu1 %2455, %v3121_v36  }
 0x244   : > { %809 = vperm.xlu0 %2456, %v3123_v37  }
 0x247   : > { %794 = vperm.xlu1 %2455, %v3127_v38  }
 0x248   : > { %815 = vperm.xlu0 %2456, %v3129_v39  }
 0x24b   : > { %800 = vperm.xlu1 %2455, %v3133_v40  }
 0x24f   : > { %806 = vperm.xlu1 %2455, %v3136_v41  }
 0x253   : > { %812 = vperm.xlu1 %2455, %v3139_v42  }
 0x2af   : > { %v777_v43 = vpop.permute.xlu0 %776 }
 0x2b0   : > { %v833_v1 = vrot.slane %v777_v43, %v3144_v60 }
 0x2b2   : > { %v774_v52 = vpop.permute.xlu1 %773 }
 0x2b3   : > { %v786_v44 = vpop.permute.xlu0 %785  ;;  %v827_v55 = vrot.slane %v774_v52, %v3147_v61 }
 0x2b4   : > { %v846_v4 = vrot.slane %v786_v44, %v3147_v61 }
 0x2b6   : > { %v771_v58 = vpop.permute.xlu1 %770 }
 0x2b7   : > { %v792_v45 = vpop.permute.xlu0 %791  ;;  %v822_v49 = vrot.slane %v771_v58, %v3144_v60 }
 0x2b9   : > { %v829_v44 = vsel %vm828_vm0, %v827_v55, %v822_v49 }
 0x2ba   : > { %v780_v47 = vpop.permute.xlu1 %779 }
 0x2bb   : > { %v798_v48 = vpop.permute.xlu0 %797  ;;  %v837_v59 = vrot.slane %v780_v47, %v3147_v61  ;;  %v855_v47 = vrot.slane %v792_v45, %v3147_v61 }
 0x2bc   : > { %v864_v43 = vrot.slane %v798_v48, %v3147_v61 }
 0x2be   : > { %v783_v50 = vpop.permute.xlu1 %782 }
 0x2bf   : > { %v804_v57 = vpop.permute.xlu0 %803  ;;  %v842_v62 = vrot.slane %v783_v50, %v3144_v60  ;;  %v838_v50 = vsel %vm828_vm0, %v837_v59, %v833_v1 }
 0x2c0   : > { %v873_v32 = vrot.slane %v804_v57, %v3147_v61  ;;  %v894_v45 = vsel %vm893_vm1, %v838_v50, %v829_v44  ;;  %v931_v44 = vsub.s32 4, %v3033_v51 }
 0x2c1   : > { %v847_v58 = vsel %vm828_vm0, %v846_v4, %v842_v62 }
 0x2c2   : > { %v789_v54 = vpop.permute.xlu1 %788  ;;  %v896_v62 = vsel %vm895_vm2, %v847_v58, %v894_v45  ;;  %v919_v58 = vsub.s32 1, %v3033_v51 }
 0x2c3   : > { %v810_v63 = vpop.permute.xlu0 %809  ;;  %v851_v2 = vrot.slane %v789_v54, %v3144_v60 }
 0x2c4   : > { %v882_v59 = vrot.slane %v810_v63, %v3147_v61 }
 0x2c6   : > { %v795_v6 = vpop.permute.xlu1 %794 }
 0x2c7   : > { %v860_v53 = vrot.slane %v795_v6, %v3144_v60  ;;  %v856_v6 = vsel %vm828_vm0, %v855_v47, %v851_v2 }
 0x2c8   : > { %v898_v49 = vsel %vm897_vm3, %v856_v6, %v896_v62  ;;  %v923_v62 = vsub.s32 2, %v3033_v51 }
 0x2c9   : > { %v865_v48 = vsel %vm828_vm0, %v864_v43, %v860_v53 }
 0x2ca   : > { %v801_v0 = vpop.permute.xlu1 %800  ;;  %v900_v4 = vsel %vm899_vm4, %v865_v48, %v898_v49 }
 0x2cb   : > { %v869_v35 = vrot.slane %v801_v0, %v3144_v60  ;;  %v816_v0 = vpop.permute.xlu0 %815 }
 0x2cc   : > { %v891_v55 = vrot.slane %v816_v0, %v3147_v61  ;;  %v943_v0 = vsub.s32 7, %v3033_v51 }
 0x2cd   : > { %v874_v1 = vsel %vm828_vm0, %v873_v32, %v869_v35 }
 0x2ce   : > { %v807_v54 = vpop.permute.xlu1 %806  ;;  %v902_v53 = vsel %vm901_vm5, %v874_v1, %v900_v4 }
 0x2cf   : > { %v878_v52 = vrot.slane %v807_v54, %v3144_v60 }
 0x2d1   : > { %v883_v57 = vsel %vm828_vm0, %v882_v59, %v878_v52 }
 0x2d2   : > { %v813_v2 = vpop.permute.xlu1 %812  ;;  %v904_v32 = vsel %vm903_vm6, %v883_v57, %v902_v53 }
 0x2d3   : > { %v887_v63 = vrot.slane %v813_v2, %v3144_v60 }
 0x2d5   : > { %v892_v47 = vsel %vm828_vm0, %v891_v55, %v887_v63  ;;  %v3534_v63 = vsub.s32 3, %v3033_v51 }
 0x2d6   : > { %v906_v35 = vsel %vm905_vm7, %v892_v47, %v904_v32 }
 0x2d7   : > { %v909_v50 = vsel %vm908_vm8, %v906_v35, -inf }
 0x2d8   : > { %910 = vmax.xlane.f32.xlu1 %v909_v50 }
 0x365   : > { %v3181_v43 = vpop.xlane.xlu1 %910 }
 0x366   : > { %v916_v54 = vrot.slane %v3181_v43, %v3039_v56  ;;  %v920_v52 = vrot.slane %v3181_v43, %v919_v58  ;;  %v932_v59 = vrot.slane %v3181_v43, %v931_v44  ;;  %v3202_v57 = vrot.slane %v3181_v43, %v943_v0 }
 0x368   : > { %v953_v6 = vsub.f32 %v3103_v8, %v916_v54  ;;  %v954_v45 = vsub.f32 %v3097_v5, %v916_v54  ;;  %v955_v1 = vsub.f32 %v3094_v3, %v920_v52  ;;  %v962_v8 = vsub.f32 %v3111_v19, %v932_v59 }
 0x369   : > { %v924_v5 = vrot.slane %v3181_v43, %v923_v62  ;;  %v956_v2 = vsub.f32 %v3109_v9, %v920_v52  ;;  %v968_v3 = vsub.f32 %v3129_v39, %v3202_v57  ;;  %v928_v9 = vrot.slane %v3181_v43, %v3534_v63 }
 0x36a   : > { %v969_v48 = vmul.f32 1.442695, %v953_v6  ;;  %v971_v49 = vmul.f32 1.442695, %v954_v45  ;;  %v973_v4 = vmul.f32 1.442695, %v955_v1 }
 0x36b   : > { %v987_v55 = vmul.f32 1.442695, %v962_v8  ;;  %v957_v19 = vsub.f32 %v3115_v25, %v924_v5  ;;  %v975_v53 = vmul.f32 1.442695, %v956_v2  ;;  %v999_v32 = vmul.f32 1.442695, %v968_v3 }
 0x36c   : > { %2458 = vpow2.f32 %v969_v48  ;;  %v958_v35 = vsub.f32 %v3099_v7, %v924_v5  ;;  %v959_v25 = vsub.f32 %v3121_v36, %v928_v9  ;;  %v3533_v45 = vsub.s32 5, %v3033_v51 }
 0x36d   : > { %2460 = vpow2.f32 %v971_v49  ;;  %v977_v39 = vmul.f32 1.442695, %v957_v19  ;;  %v960_v7 = vsub.f32 %v3105_v10, %v928_v9  ;;  %v961_v49 = vsub.f32 %v3127_v38, %v932_v59 }
 0x36e   : > { %2462 = vpow2.f32 %v973_v4  ;;  %v979_v54 = vmul.f32 1.442695, %v958_v35  ;;  %v981_v48 = vmul.f32 1.442695, %v959_v25  ;;  %v936_v36 = vrot.slane %v3181_v43, %v3533_v45 }
 0x36f   : > { %2464 = vpow2.f32 %v987_v55  ;;  %v983_v8 = vmul.f32 1.442695, %v960_v7  ;;  %v3532_v10 = vsub.s32 6, %v3033_v51  ;;  %v985_v55 = vmul.f32 1.442695, %v961_v49 }
 0x370   : > { %2466 = vpow2.f32 %v975_v53  ;;  %v963_v4 = vsub.f32 %v3133_v40, %v936_v36  ;;  %v964_v59 = vsub.f32 %v3117_v30, %v936_v36  ;;  %v967_v30 = vsub.f32 %v3139_v42, %v3202_v57 }
 0x371   : > { %2468 = vpow2.f32 %v999_v32  ;;  %v940_v38 = vrot.slane %v3181_v43, %v3532_v10 }
 0x372   : > { %2470 = vpow2.f32 %v977_v39  ;;  %v989_v19 = vmul.f32 1.442695, %v963_v4  ;;  %v991_v32 = vmul.f32 1.442695, %v964_v59 }
 0x373   : > { %2472 = vpow2.f32 %v979_v54  ;;  %v965_v40 = vsub.f32 %v3136_v41, %v940_v38  ;;  %v966_v35 = vsub.f32 %v3123_v37, %v940_v38  ;;  %v997_v54 = vmul.f32 1.442695, %v967_v30 }
 0x374   : > { %2474 = vpow2.f32 %v981_v48 }
 0x375   : > { %2476 = vpow2.f32 %v983_v8  ;;  %v993_v43 = vmul.f32 1.442695, %v965_v40  ;;  %v995_v25 = vmul.f32 1.442695, %v966_v35 }
 0x376   : > { %v3212_v47 = vpop.eup %2458  ;;  %2478 = vpow2.f32 %v985_v55 }
 0x377   : > { %1018 = vperm.xlu0 %2456, %v3212_v47   ;;  %v3219_v50 = vpop.eup %2460  ;;  %2480 = vpow2.f32 %v989_v19 }
 0x378   : > { %v3223_v6 = vpop.eup %2462  ;;  %2482 = vpow2.f32 %v991_v32 }
 0x379   : > { %v3225_v52 = vpop.eup %2464  ;;  %2484 = vpow2.f32 %v993_v43 }
 0x37a   : > { %1045 = vperm.xlu1 %2455, %v3225_v52   ;;  %v3231_v1 = vpop.eup %2466  ;;  %2486 = vpow2.f32 %v995_v25 }
 0x37b   : > { %1021 = vperm.xlu0 %2456, %v3219_v50   ;;  %v3238_v5 = vpop.eup %2468  ;;  %2488 = vpow2.f32 %v997_v54 }
 0x37c   : > { %v3240_v2 = vpop.eup %2470 }
 0x37d   : > { %v3246_v3 = vpop.eup %2472 }
 0x37e   : > { %1063 = vperm.xlu1 %2455, %v3238_v5   ;;  %v3253_v53 = vpop.eup %2474 }
 0x37f   : > { %1024 = vperm.xlu0 %2456, %v3223_v6   ;;  %v3257_v9 = vpop.eup %2476 }
 0x380   : > { %v3261_v39 = vpop.eup %2478 }
 0x381   : > { %v3266_v41 = vpop.eup %2480 }
 0x382   : > { %v3269_v7 = vpop.eup %2482 }
 0x383   : > { %1027 = vperm.xlu0 %2456, %v3231_v1   ;;  %v3272_v37 = vpop.eup %2484 }
 0x384   : > { %v3275_v48 = vpop.eup %2486 }
 0x385   : > { %v3278_v42 = vpop.eup %2488 }
 0x387   : > { %1030 = vperm.xlu0 %2456, %v3240_v2  }
 0x38b   : > { %1033 = vperm.xlu0 %2456, %v3246_v3  }
 0x38f   : > { %1036 = vperm.xlu0 %2456, %v3253_v53  }
 0x393   : > { %1039 = vperm.xlu0 %2456, %v3257_v9  }
 0x397   : > { %1042 = vperm.xlu0 %2456, %v3261_v39  }
 0x39b   : > { %1048 = vperm.xlu0 %2456, %v3266_v41  }
 0x39f   : > { %1051 = vperm.xlu0 %2456, %v3269_v7  }
 0x3a3   : > { %1054 = vperm.xlu0 %2456, %v3272_v37  }
 0x3a7   : > { %1057 = vperm.xlu0 %2456, %v3275_v48  }
 0x3ab   : > { %1060 = vperm.xlu0 %2456, %v3278_v42  }
 0x3f6   : > { %v1019_v57 = vpop.permute.xlu0 %1018 }
 0x3f7   : > { %v1068_v15 = vrot.slane %v1019_v57, %v3144_v60 }
 0x3f9   : > { %v1046_v43 = vpop.permute.xlu1 %1045 }
 0x3fa   : > { %v1022_v36 = vpop.permute.xlu0 %1021 }
 0x3fb   : > { %v1072_v54 = vrot.slane %v1022_v36, %v3147_v61 }
 0x3fd   : > { %v1064_v57 = vpop.permute.xlu1 %1063 }
 0x3fe   : > { %v1025_v49 = vpop.permute.xlu0 %1024 }
 0x3ff   : > { %v1077_v31 = vrot.slane %v1025_v49, %v3144_v60  ;;  %v1073_v49 = vsel %vm828_vm0, %v1072_v54, %v1068_v15 }
 0x402   : > { %v1028_v8 = vpop.permute.xlu0 %1027 }
 0x403   : > { %v1081_v35 = vrot.slane %v1028_v8, %v3147_v61 }
 0x405   : > { %v1082_v10 = vsel %vm828_vm0, %v1081_v35, %v1077_v31 }
 0x406   : > { %v1031_v4 = vpop.permute.xlu0 %1030  ;;  %v1137_v31 = vsel %vm893_vm1, %v1082_v10, %v1073_v49 }
 0x407   : > { %v1086_v21 = vrot.slane %v1031_v4, %v3144_v60 }
 0x40a   : > { %v1034_v55 = vpop.permute.xlu0 %1033 }
 0x40b   : > { %v1090_v30 = vrot.slane %v1034_v55, %v3147_v61  ;;  %v1108_v55 = vrot.slane %v1046_v43, %v3147_v61 }
 0x40d   : > { %v1091_v36 = vsel %vm828_vm0, %v1090_v30, %v1086_v21 }
 0x40e   : > { %v1037_v38 = vpop.permute.xlu0 %1036  ;;  %v1138_v35 = vsel %vm895_vm2, %v1091_v36, %v1137_v31 }
 0x40f   : > { %v1095_v8 = vrot.slane %v1037_v38, %v3144_v60 }
 0x412   : > { %v1040_v59 = vpop.permute.xlu0 %1039 }
 0x413   : > { %v1099_v26 = vrot.slane %v1040_v59, %v3147_v61 }
 0x415   : > { %v1100_v59 = vsel %vm828_vm0, %v1099_v26, %v1095_v8 }
 0x416   : > { %v1043_v19 = vpop.permute.xlu0 %1042  ;;  %v1139_v43 = vsel %vm897_vm3, %v1100_v59, %v1138_v35 }
 0x417   : > { %v1104_v20 = vrot.slane %v1043_v19, %v3144_v60 }
 0x419   : > { %v1109_v38 = vsel %vm828_vm0, %v1108_v55, %v1104_v20 }
 0x41a   : > { %v1049_v40 = vpop.permute.xlu0 %1048 }
 0x41b   : > { %v1113_v4 = vrot.slane %v1049_v40, %v3144_v60  ;;  %v1135_v40 = vrot.slane %v1064_v57, %v3147_v61 }
 0x41e   : > { %v1052_v32 = vpop.permute.xlu0 %1051 }
 0x41f   : > { %v1117_v45 = vrot.slane %v1052_v32, %v3147_v61 }
 0x421   : > { %v1118_v21 = vsel %vm828_vm0, %v1117_v45, %v1113_v4 }
 0x422   : > { %v1055_v25 = vpop.permute.xlu0 %1054 }
 0x423   : > { %v1122_v32 = vrot.slane %v1055_v25, %v3144_v60 }
 0x426   : > { %v1058_v63 = vpop.permute.xlu0 %1057 }
 0x427   : > { %v1126_v19 = vrot.slane %v1058_v63, %v3147_v61  ;;  %v1140_v63 = vsel %vm899_vm4, %v1109_v38, %v1139_v43  ;;  %v2709_v38 = vmov 0.0|0.0  }
 0x428   : > { %v1141_v10 = vsel %vm901_vm5, %v1118_v21, %v1140_v63  ;;  %2357 = vmatprep.subr.bf16.mxu1 %v2709_v38 }
 0x429   : > { %v1127_v15 = vsel %vm828_vm0, %v1126_v19, %v1122_v32 }
 0x42a   : > { %v1061_v26 = vpop.permute.xlu0 %1060  ;;  %v1142_v25 = vsel %vm903_vm6, %v1127_v15, %v1141_v10 }
 0x42b   : > { %v1131_v30 = vrot.slane %v1061_v26, %v3144_v60 }
 0x42d   : > { %v1136_v20 = vsel %vm828_vm0, %v1135_v40, %v1131_v30  ;;  %v3558_v40 = vsub.s32 6, %v3033_v51 }
 0x42e   : > { %v1143_v54 = vsel %vm905_vm7, %v1136_v20, %v1142_v25 }
 0x42f   : > { %v1145_v45 = vsel %vm908_vm8, %v1143_v54, 0.0 }
 0x430   : > { %1146 = vadd.xlane.f32.xlu0 %v1145_v45 }
 0x4bd   : > { %v1147_v8 = vpop.xlane.xlu0 %1146 }
 0x4be   : > { %v1168_v55 = vrot.slane %v1147_v8, %v931_v44  ;;  %v1152_v36 = vrot.slane %v1147_v8, %v3039_v56  ;;  %v1180_v49 = vrot.slane %v1147_v8, %v943_v0  ;;  %v1156_v59 = vrot.slane %v1147_v8, %v919_v58 }
 0x4bf   : > { %v1160_v31 = vrot.slane %v1147_v8, %v923_v62  ;;  %v3556_v62 = vsub.s32 3, %v3033_v51  ;;  %v1176_v63 = vrot.slane %v1147_v8, %v3558_v40  ;;  %v3565_v40 = vpack.c.bf16 %v3010_v34, %v3007_v33 }
 0x4c0   : > { %2490 = vrcp.f32 %v1168_v55 }
 0x4c1   : > { %2492 = vrcp.f32 %v1152_v36  ;;  %v1164_v35 = vrot.slane %v1147_v8, %v3556_v62  ;;  %v3563_v62 = vpack.c.bf16 %v2994_v27, %v2989_v24 }
 0x4c2   : > { %2494 = vrcp.f32 %v1180_v49  ;;  %v3560_v49 = vpack.c.bf16 %v2970_v16, %v2965_v14 }
 0x4c3   : > { %2496 = vrcp.f32 %v1156_v59 }
 0x4c4   : > { %2498 = vrcp.f32 %v1160_v31 }
 0x4c5   : > { %2500 = vrcp.f32 %v1164_v35 }
 0x4ca   : > { %v2491_v4 = vpop.eup %2490 }
 0x4cb   : > { %v2493_v19 = vpop.eup %2492  ;;  %v1202_v57 = vmul.f32 %v2491_v4, %v3261_v39  ;;  %v2358_v39 = vpack.c.bf16 %v3015_v46, %v2955_v11  ;;  %v3557_v46 = vsub.s32 5, %v3033_v51 }
 0x4cc   : > { %v2495_v44 = vpop.eup %2494  ;;  %v1190_v56 = vmul.f32 %v2493_v19, %v3212_v47  ;;  %v1191_v58 = vmul.f32 %v2493_v19, %v3219_v50 }
 0x4cd   : > { %1254 = vperm.xlu0 %2456, %v1202_v57   ;;  %v1212_v0 = vmul.f32 %v2495_v44, %v3238_v5  ;;  %v2497_v32 = vpop.eup %2496  ;;  %2359 = vmatpush3.bf16.msra.mxu1 %v2358_v39  ;;  %v2711_v5 = vmov 0.0   ;;  %v3561_v57 = vpack.c.bf16 %v2976_v18, %v2973_v17  ;;  %v3562_v18 = vpack.c.bf16 %v2986_v23, %v2983_v22 }
 0x4ce   : > { %1230 = vperm.xlu1 %2455, %v1190_v56   ;;  %v1193_v47 = vmul.f32 %v2497_v32, %v3223_v6  ;;  %2273 = vmatprep.mubr.msk.f32.mxu1 %vm2710_vm9, %v2711_v5  ;;  %v1194_v50 = vmul.f32 %v2497_v32, %v3231_v1  ;;  %v2499_v21 = vpop.eup %2498  ;;  %v1172_v6 = vrot.slane %v1147_v8, %v3557_v46 }
 0x4cf   : > { %2360 = vmatprep.subr.bf16.mxu1 %v2709_v38  ;;  %v1196_v11 = vmul.f32 %v2499_v21, %v3240_v2  ;;  %v1197_v43 = vmul.f32 %v2499_v21, %v3246_v3  ;;  %v2501_v15 = vpop.eup %2500  ;;  %v1203_v2 = vmul.f32 %v2491_v4, %v3225_v52  ;;  %v3564_v21 = vpack.c.bf16 %v3000_v29, %v2997_v28 }
 0x4d0   : > { %2502 = vrcp.f32 %v1172_v6  ;;  %v1199_v26 = vmul.f32 %v2501_v15, %v3253_v53  ;;  %v1200_v1 = vmul.f32 %v2501_v15, %v3257_v9  ;;  %v1211_v9 = vmul.f32 %v2495_v44, %v3278_v42 }
 0x4d1   : > { %1275 = vperm.xlu0 %2456, %v1212_v0   ;;  %2504 = vrcp.f32 %v1176_v63 }
 0x4d2   : > { %1233 = vperm.xlu1 %2455, %v1191_v58  }
 0x4d6   : > { %1236 = vperm.xlu1 %2455, %v1193_v47  }
 0x4da   : > { %1239 = vperm.xlu1 %2455, %v1194_v50   ;;  %v2503_v30 = vpop.eup %2502 }
 0x4db   : > { %v1205_v10 = vmul.f32 %v2503_v30, %v3266_v41  ;;  %v1206_v3 = vmul.f32 %v2503_v30, %v3269_v7  ;;  %v2505_v20 = vpop.eup %2504 }
 0x4dc   : > { %v1208_v53 = vmul.f32 %v2505_v20, %v3272_v37  ;;  %v1209_v51 = vmul.f32 %v2505_v20, %v3275_v48  ;;  %v3559_v37 = vpack.c.bf16 %v2962_v13, %v2959_v12 }
 0x4de   : > { %1242 = vperm.xlu1 %2455, %v1196_v11  }
 0x4e2   : > { %1245 = vperm.xlu1 %2455, %v1197_v43  }
 0x4e6   : > { %1248 = vperm.xlu1 %2455, %v1199_v26  }
 0x4ea   : > { %1251 = vperm.xlu1 %2455, %v1200_v1  }
 0x4ee   : > { %1257 = vperm.xlu1 %2455, %v1203_v2  }
 0x4f2   : > { %1260 = vperm.xlu1 %2455, %v1205_v10  }
 0x4f6   : > { %1263 = vperm.xlu1 %2455, %v1206_v3  }
 0x4fa   : > { %1266 = vperm.xlu1 %2455, %v1208_v53  }
 0x4fe   : > { %1269 = vperm.xlu1 %2455, %v1209_v51  }
 0x502   : > { %1272 = vperm.xlu1 %2455, %v1211_v9  }
 0x54c   : > { %v1255_v44 = vpop.permute.xlu0 %1254 }
 0x54d   : > { %v1231_v25 = vpop.permute.xlu1 %1230  ;;  %v1316_v58 = vrot.slane %v1255_v44, %v3144_v60 }
 0x54e   : > { %v1280_v54 = vrot.slane %v1231_v25, %v3144_v60 }
 0x550   : > { %v1276_v46 = vpop.permute.xlu0 %1275 }
 0x551   : > { %v1234_v52 = vpop.permute.xlu1 %1233 }
 0x552   : > { %v1284_v41 = vrot.slane %v1234_v52, %v3147_v61 }
 0x554   : > { %v1285_v45 = vsel %vm828_vm0, %v1284_v41, %v1280_v54 }
 0x555   : > { %2274 = vmatmul.mubr.msk.f32.vlgmr.msra.gmra.mrb[0].mxu1 %vm908_vm8, %v1285_v45  ;;  %v1237_v7 = vpop.permute.xlu1 %1236 }
 0x556   : > { %2362 = vmatpush3.bf16.msra.mxu1 %v3559_v37  ;;  %2280 = vmatprep.mubr.msk.f32.mxu1 %vm2710_vm9, %v2711_v5  ;;  %v1289_v42 = vrot.slane %v1237_v7, %v3144_v60 }
 0x557   : > { %2363 = vmatprep.subr.bf16.mxu1 %v2709_v38 }
 0x559   : > { %v1240_v48 = vpop.permute.xlu1 %1239 }
 0x55a   : > { %v1293_v8 = vrot.slane %v1240_v48, %v3147_v61 }
 0x55c   : > { %v1294_v55 = vsel %vm828_vm0, %v1293_v8, %v1289_v42 }
 0x55d   : > { %2281 = vmatmul.mubr.msk.f32.vlgmr.msra.gmra.mrb[2].mxu1 %vm908_vm8, %v1294_v55  ;;  %v1243_v36 = vpop.permute.xlu1 %1242  ;;  %v1349_v6 = vsel %vm893_vm1, %v1294_v55, %v1285_v45 }
 0x55e   : > { %2365 = vmatpush3.bf16.msra.mxu1 %v3560_v49  ;;  %2287 = vmatprep.mubr.msk.f32.mxu1 %vm2710_vm9, %v2711_v5  ;;  %v1298_v13 = vrot.slane %v1243_v36, %v3144_v60 }
 0x55f   : > { %2366 = vmatprep.subr.bf16.mxu1 %v2709_v38 }
 0x561   : > { %v1246_v12 = vpop.permute.xlu1 %1245 }
 0x562   : > { %v1302_v59 = vrot.slane %v1246_v12, %v3147_v61 }
 0x564   : > { %v1303_v4 = vsel %vm828_vm0, %v1302_v59, %v1298_v13 }
 0x565   : > { %2288 = vmatmul.mubr.msk.f32.vlgmr.msra.gmra.mrb[4].mxu1 %vm908_vm8, %v1303_v4  ;;  %v1249_v19 = vpop.permute.xlu1 %1248  ;;  %v1350_v43 = vsel %vm895_vm2, %v1303_v4, %v1349_v6 }
 0x566   : > { %2368 = vmatpush3.bf16.msra.mxu1 %v3561_v57  ;;  %2294 = vmatprep.mubr.msk.f32.mxu1 %vm2710_vm9, %v2711_v5  ;;  %v1307_v16 = vrot.slane %v1249_v19, %v3144_v60 }
 0x567   : > { %2369 = vmatprep.subr.bf16.mxu1 %v2709_v38 }
 0x569   : > { %v1252_v14 = vpop.permute.xlu1 %1251 }
 0x56a   : > { %v1311_v31 = vrot.slane %v1252_v14, %v3147_v61 }
 0x56c   : > { %v1312_v56 = vsel %vm828_vm0, %v1311_v31, %v1307_v16 }
 0x56d   : > { %2295 = vmatmul.mubr.msk.f32.vlgmr.msra.gmra.mrb[6].mxu1 %vm908_vm8, %v1312_v56  ;;  %v1258_v0 = vpop.permute.xlu1 %1257  ;;  %v1351_v28 = vsel %vm897_vm3, %v1312_v56, %v1350_v43 }
 0x56e   : > { %v1320_v17 = vrot.slane %v1258_v0, %v3147_v61  ;;  %2371 = vmatpush3.bf16.msra.mxu1 %v3562_v18  ;;  %2301 = vmatprep.mubr.msk.f32.mxu1 %vm2710_vm9, %v2711_v5 }
 0x56f   : > { %2372 = vmatprep.subr.bf16.mxu1 %v2709_v38 }
 0x570   : > { %v1321_v32 = vsel %vm828_vm0, %v1320_v17, %v1316_v58 }
 0x571   : > { %2302 = vmatmul.mubr.msk.f32.vlgmr.msra.gmra.mrb[8].mxu1 %vm908_vm8, %v1321_v32  ;;  %v1261_v39 = vpop.permute.xlu1 %1260  ;;  %v1352_v26 = vsel %vm899_vm4, %v1321_v32, %v1351_v28 }
 0x572   : > { %2374 = vmatpush3.bf16.msra.mxu1 %v3563_v62  ;;  %2308 = vmatprep.mubr.msk.f32.mxu1 %vm2710_vm9, %v2711_v5  ;;  %v1325_v23 = vrot.slane %v1261_v39, %v3144_v60 }
 0x573   : > { %2375 = vmatprep.subr.bf16.mxu1 %v2709_v38 }
 0x575   : > { %v1264_v22 = vpop.permute.xlu1 %1263 }
 0x576   : > { %v1329_v35 = vrot.slane %v1264_v22, %v3147_v61 }
 0x578   : > { %v1330_v47 = vsel %vm828_vm0, %v1329_v35, %v1325_v23 }
 0x579   : > { %2309 = vmatmul.mubr.msk.f32.vlgmr.msra.gmra.mrb[10].mxu1 %vm908_vm8, %v1330_v47  ;;  %v1267_v50 = vpop.permute.xlu1 %1266  ;;  %v1353_v1 = vsel %vm901_vm5, %v1330_v47, %v1352_v26 }
 0x57a   : > { %2377 = vmatpush3.bf16.msra.mxu1 %v3564_v21  ;;  %2315 = vmatprep.mubr.msk.f32.mxu1 %vm2710_vm9, %v2711_v5  ;;  %v1334_v27 = vrot.slane %v1267_v50, %v3144_v60 }
 0x57b   : > { %2378 = vmatprep.subr.bf16.mxu1 %v2709_v38  ;;  %v1347_v38 = vrot.slane %v1276_v46, %v3147_v61 }
 0x57d   : > { %v1270_v24 = vpop.permute.xlu1 %1269 }
 0x57e   : > { %v1338_v11 = vrot.slane %v1270_v24, %v3147_v61 }
 0x580   : > { %v1339_v15 = vsel %vm828_vm0, %v1338_v11, %v1334_v27 }
 0x581   : > { %2316 = vmatmul.mubr.msk.f32.vlgmr.msra.gmra.mrb[12].mxu1 %vm908_vm8, %v1339_v15  ;;  %v1273_v29 = vpop.permute.xlu1 %1272  ;;  %v1354_v2 = vsel %vm903_vm6, %v1339_v15, %v1353_v1 }
 0x582   : > { %2380 = vmatpush3.bf16.msra.mxu1 %v3565_v40  ;;  %v1343_v63 = vrot.slane %v1273_v29, %v3144_v60  ;;  %2322 = vmatprep.mubr.msk.f32.mxu1 %vm2710_vm9, %v2711_v5 }
 0x584   : > { %v1348_v30 = vsel %vm828_vm0, %v1347_v38, %v1343_v63 }
 0x585   : > { %v1355_v61 = vsel %vm905_vm7, %v1348_v30, %v1354_v2  ;;  %2323 = vmatmul.mubr.msk.f32.vlgmr.msra.gmra.mrb[14].mxu1 %vm908_vm8, %v1348_v30 }
 0x586   : > { %1357 = vst.msk [vmem:[%s358_s10] sm:$0xff] %vm908_vm8, %v1355_v61 }
 0x587   : > { %2607 = shalt.err (!%p2604_p2)
}
 0x588   : > { %s2608_s30 = scalar_lea.hbm %s3438_s14, 128  ;;  %s2612_s12 = scalar_lea.hbm %s3522_s7, 256 }
 0x589   : > { %p2609_p6 = scmp.ne.s32.totalorder %s3438_s14, %s2608_s30  ;;  %p2613_p12 = scmp.lt.u32.totalorder %s3438_s14, %s3522_s7 }
 0x58a   : > { %p2614_p11 = scmp.lt.u32.totalorder %s2612_s12, %s2608_s30  ;;  %p2616_p10 = scmp.lt.u32.totalorder %s2608_s30, %s3438_s14 }
 0x58b   : > { %p2610_p8 = pnand %p2609_p6, %p3566_p13 }
 0x58c   : > { %p2615_p0 = por %p2614_p11, %p2613_p12 }
 0x58d   : > { %p2611_p4 = pneg %p2610_p8 }
 0x58e   : > { %p2617_p3 = por %p2616_p10, %p2615_p0 }
 0x590   : > { %p2618_p7 = pnand %p2617_p3, %p2611_p4 }
 0x592   : > { %2621 = shalt.err (!%p2618_p7)
}
 0x593   : > { %2390 = dma.vmem_to_hbm [thread:$0]  (%p3566_p13), %s1991_s20, 128, %s3438_s14, %s1964_s17  }
 0x594   : > { %s351_s10 = scalar_lea.vmem [#allocation8], %s2943_s26  ;;  %s3470_s20 = scalar_lea.hbm %s3521_s6, %s2152_s0 }
 0x595   : > { %s1977_s18 = sshll.u32 %s351_s10, 4  ;;  %s1959_s17 = scalar_lea.sflag [#allocation4], %s2931_s13  ;;  %s3472_s18 = int_to_ptr.vmem [resolvable:$true] %s1977_s18 }
 0x596   : > { %s2622_s26 = scalar_lea.vmem %s3472_s18, 128  ;;  %s2713_s28 = smov [#allocation8]  }
 0x597   : > { %p2623_p9 = scmp.ne.s32.totalorder %s3472_s18, %s2622_s26  ;;  %s2626_s21 = sshll.u32 %s2713_s28, 4  ;;  %s2627_s21 = int_to_ptr.vmem [resolvable:$false] %s2626_s21 }
 0x598   : > { %s2628_s2 = scalar_lea.vmem %s2627_s21, 256  ;;  %p2629_p2 = scmp.lt.s32.totalorder %s3472_s18, %s2627_s21 }
 0x599   : > { %p2624_p1 = pnand %p2623_p9, %p3566_p13  ;;  %p2630_p6 = scmp.lt.s32.totalorder %s2628_s2, %s2622_s26 }
 0x59b   : > { %p2625_p5 = pneg %p2624_p1  ;;  %p2631_p8 = por %p2630_p6, %p2629_p2 }
 0x59d   : > { %p2632_p4 = pnand %p2631_p8, %p2625_p5 }
 0x628   : > { %v1426_v33 = vpop.f32.mrb[0].mxu1 }
 0x629   : > { %v2275_v34 = vpop.f32.mrb[1].mxu1 }
 0x630   : > { %v1498_v60 = vpop.f32.mrb[2].mxu1 }
 0x631   : > { %v1942_v5 = vrot.slane %v1498_v60, 7  ;;  %v2282_v10 = vpop.f32.mrb[3].mxu1 }
 0x633   : > { %v1943_v3 = vsel %vm893_vm1, %v1942_v5, %v1426_v33 }
 0x638   : > { %v1570_v20 = vpop.f32.mrb[4].mxu1 }
 0x639   : > { %v1944_v53 = vrot.slane %v1570_v20, 6  ;;  %v2289_v51 = vpop.f32.mrb[5].mxu1 }
 0x63b   : > { %v1945_v9 = vsel %vm895_vm2, %v1944_v53, %v1943_v3 }
 0x640   : > { %v1642_v25 = vpop.f32.mrb[6].mxu1 }
 0x641   : > { %v1946_v52 = vrot.slane %v1642_v25, 5  ;;  %v2296_v54 = vpop.f32.mrb[7].mxu1 }
 0x643   : > { %v1947_v41 = vsel %vm897_vm3, %v1946_v52, %v1945_v9 }
 0x644   : > { %v1714_v45 = vpop.f32.mrb[8].mxu1 }
 0x645   : > { %v1948_v7 = vrot.slane %v1714_v45, 4  ;;  %v2303_v37 = vpop.f32.mrb[9].mxu1 }
 0x647   : > { %v1949_v48 = vsel %vm899_vm4, %v1948_v7, %v1947_v41 }
 0x64c   : > { %v1786_v42 = vpop.f32.mrb[10].mxu1 }
 0x64d   : > { %v1950_v8 = vrot.slane %v1786_v42, 3  ;;  %v2310_v55 = vpop.f32.mrb[11].mxu1 }
 0x64f   : > { %v1951_v36 = vsel %vm901_vm5, %v1950_v8, %v1949_v48 }
 0x654   : > { %v1858_v49 = vpop.f32.mrb[12].mxu1 }
 0x655   : > { %v1952_v12 = vrot.slane %v1858_v49, 2  ;;  %v2317_v13 = vpop.f32.mrb[13].mxu1 }
 0x657   : > { %v1953_v59 = vsel %vm903_vm6, %v1952_v12, %v1951_v36 }
 0x658   : > { %v1930_v4 = vpop.f32.mrb[14].mxu1 }
 0x659   : > { %v1954_v19 = vrot.slane %v1930_v4, 1  ;;  %v2324_v57 = vpop.f32.mrb[15].mxu1 }
 0x65b   : > { %v1955_v14 = vsel %vm905_vm7, %v1954_v19, %v1953_v59 }
 0x65c   : > { %1957 = vst [vmem:[%s351_s10] sm:$0xff] %v1955_v14 }
 0x65d   : > { %2635 = shalt.err (!%p2632_p4)
}
 0x65e   : > { %s2636_s13 = scalar_lea.hbm %s3470_s20, 128  ;;  %s2640_s16 = scalar_lea.hbm %s3521_s6, 256 }
 0x65f   : > { %p2637_p12 = scmp.ne.s32.totalorder %s3470_s20, %s2636_s13  ;;  %p2641_p10 = scmp.lt.u32.totalorder %s3470_s20, %s3521_s6 }
 0x660   : > { %p2642_p3 = scmp.lt.u32.totalorder %s2640_s16, %s2636_s13  ;;  %p2644_p9 = scmp.lt.u32.totalorder %s2636_s13, %s3470_s20 }
 0x661   : > { %p2638_p11 = pnand %p2637_p12, %p3566_p13 }
 0x662   : > { %p2643_p7 = por %p2642_p3, %p2641_p10 }
 0x663   : > { %p2639_p0 = pneg %p2638_p11 }
 0x664   : > { %p2645_p1 = por %p2644_p9, %p2643_p7 }
 0x666   : > { %p2646_p5 = pnand %p2645_p1, %p2639_p0 }
 0x668   : > { %2649 = shalt.err (!%p2646_p5)
}
 0x669   : > { %2389 = dma.vmem_to_hbm [thread:$0]  (%p3566_p13), %s3472_s18, 128, %s3470_s20, %s1959_s17  }
 0x66a PF: > { %s2002_s29 = sand.u32 1, %s2688_s24   ;;  %p3567_p2 = scmp.ne.s32.totalorder %s3539_s8, 0 }
 0x66b   : > { %p3568_p6 = scmp.ge.s32.totalorder %s2700_s27, 2  ;;  %s2003_s12 = scalar_lea.sflag [#allocation4], %s2002_s29 }
 0x66d   : > { %p2405_p8 = pnand %p3568_p6, %p3567_p2 }
 0x66f   : > { %2679 = dma.done.wait (!%p2405_p8), %s2003_s12, 128  }
 0x670   : > { %2681 = vsyncadd (!%p2405_p8), %s2003_s12, 4294967168  ;;  %s2012_s15 = scalar_lea.sflag [#allocation10], %s2002_s29 }
 0x671   : > { %2683 = dma.done.wait (!%p2405_p8), %s2012_s15, 128  }
 0x672   : > { %2685 = vsyncadd (!%p2405_p8), %s2012_s15, 4294967168  ;;  %s3569_s27 = sld [smem:[#allocation17_spill]]  ;;  %s3570_s19 = sld [smem:[#allocation16_spill]] }
 0x673   : > { %s3571_s26 = sld [smem:[#allocation18_spill]]  ;;  %s3572_s24 = smov %s2692_s25 }
 0x678   : > { %p27_p13 = scmp.ge.s32.totalorder %s3569_s27, 4   ;;  %s3573_s25 = smov %s3570_s19 }
 0x67a   :  { %29 = sbr.rel (!%p27_p13) target bundleno = 12 (0xc), region = 123 }
 0x681   :  { %2017 = vsyncpa [#allocation3], 1 }
 0x682   :  { %2019 = vsyncpa [#allocation3 + $0x1], 1 }
 0x683   :  { %2020 = vsyncpa [#allocation6], 1 }
 0x684   :  { %2022 = vsyncpa [#allocation6 + $0x1], 1 }
 0x685   :  { %2023 = vsyncpa [#allocation4], 1 }
 0x686   :  { %2025 = vsyncpa [#allocation4 + $0x1], 1 }
 0x687   :  { %2026 = vsyncpa [#allocation10], 1 }
 0x688   :  { %2028 = vsyncpa [#allocation10 + $0x1], 1 }

</bundles_post_ra>
